<compile_context>
chip_gen: v5e
topology: v5e:2x2
jax: 0.10.0
libtpu: 0.0.40
codegen_flags: <defaults>
</compile_context>

<pallas_src>
import functools

import jax
import jax.numpy as jnp
from jax.experimental import pallas as pl
from jax.experimental.pallas import tpu as pltpu

# ----------------------------------------------------------------------------
# Config (bert-base-like hidden size so the 768 -> n_classes classifier matches
# the hard-coded Linear(768, n_classes) in the torch module; fewer layers to
# stay small).
# ----------------------------------------------------------------------------
CFG = dict(
    vocab_size=100,
    max_position=32,
    type_vocab_size=2,
    hidden=768,
    num_layers=2,
    num_heads=12,
    head_dim=64,
    intermediate=3072,
    n_classes=5,
    ln_eps=1e-12,
)

LANES = 128
COMPUTE_DTYPE = jnp.bfloat16
# 32 MiB scoped VMEM: fits comfortably on v5e/v6e (128 MiB) and v7x (64 MiB).
_VMEM_LIMIT = 32 * 1024 * 1024


def _ln_f32(x, gamma, beta, eps):
    """Row-wise LayerNorm in f32. gamma/beta are (1, H) f32."""
    mu = jnp.mean(x, axis=-1, keepdims=True)
    var = jnp.mean(jnp.square(x - mu), axis=-1, keepdims=True)
    return (x - mu) * jax.lax.rsqrt(var + eps) * gamma + beta


# ----------------------------------------------------------------------------
# Fused (optional embedding-LN) + QKV projection + multi-head attention
# ----------------------------------------------------------------------------
def _qkv_attention_kernel(*refs, scale, heads_per_block, head_dim,
                          apply_ln, eps):
    if apply_ln:
        (x_ref, w_ref, b_ref, bias_ref, g_ref, be_ref,
         lnout_ref, ctx_ref) = refs
    else:
        (x_ref, w_ref, b_ref, bias_ref, ctx_ref) = refs

    if apply_ln:
        xf = _ln_f32(x_ref[...].astype(jnp.float32), g_ref[...], be_ref[...], eps)
        # Output the normalized embeddings once (residual path for layer 0).
        lnout_ref[...] = xf.astype(lnout_ref.dtype)
        xm = xf.astype(w_ref.dtype)
    else:
        xm = x_ref[...]

    # (M, 3*hb) = [Q_group | K_group | V_group] for this grid step's head group.
    qkv = jnp.dot(xm, w_ref[...], preferred_element_type=jnp.float32) + b_ref[...]
    hb = heads_per_block * head_dim
    bias = bias_ref[...]  # (M, M) f32: key-padding + cross-batch additive mask

    outs = []
    for h in range(heads_per_block):
        q = qkv[:, h * head_dim:(h + 1) * head_dim]
        k = qkv[:, hb + h * head_dim:hb + (h + 1) * head_dim]
        v = qkv[:, 2 * hb + h * head_dim:2 * hb + (h + 1) * head_dim]
        s = jax.lax.dot_general(q, k, (((1,), (1,)), ((), ())),
                                preferred_element_type=jnp.float32) * scale
        s = s + bias
        m = jnp.max(s, axis=-1, keepdims=True)
        p = jnp.exp(s - m)
        denom = jnp.sum(p, axis=-1, keepdims=True)
        p = p * pl.reciprocal(denom, approx=True)
        outs.append(jnp.dot(p.astype(COMPUTE_DTYPE), v.astype(COMPUTE_DTYPE),
                            preferred_element_type=jnp.float32))
    ctx_ref[...] = jnp.concatenate(outs, axis=1).astype(ctx_ref.dtype)


def qkv_attention(x, w_packed, b_packed, bias2d, *, num_heads, head_dim, hidden,
                  ln_gamma=None, ln_beta=None, eps=CFG["ln_eps"]):
    """Fused QKV projection + attention.

    w_packed: (H, 3H) with columns packed per head group g as
              [Q heads of g | K heads of g | V heads of g] (each 128 lanes).
    Returns ctx (M, H) in merged head layout; if ln_gamma is given, also returns
    the LayerNorm'd x (used as the residual for the first encoder layer).
    """
    M = x.shape[0]
    heads_per_block = LANES // head_dim              # 2 heads -> 128 ctx lanes
    assert num_heads % heads_per_block == 0
    n_groups = num_heads // heads_per_block
    hb = heads_per_block * head_dim                  # 128
    gw = 3 * hb                                      # 384 weight lanes / group
    apply_ln = ln_gamma is not None
    scale = 1.0 / (head_dim ** 0.5)

    in_specs = [
        pl.BlockSpec((M, hidden), lambda g: (0, 0)),
        pl.BlockSpec((hidden, gw), lambda g: (0, g)),
        pl.BlockSpec((1, gw), lambda g: (0, g)),
        pl.BlockSpec((M, M), lambda g: (0, 0)),
    ]
    args = [x, w_packed, b_packed.reshape(1, 3 * hidden), bias2d]

    if apply_ln:
        in_specs += [pl.BlockSpec((1, hidden), lambda g: (0, 0)),
                     pl.BlockSpec((1, hidden), lambda g: (0, 0))]
        args += [ln_gamma.reshape(1, hidden), ln_beta.reshape(1, hidden)]
        out_shape = (jax.ShapeDtypeStruct((M, hidden), x.dtype),
                     jax.ShapeDtypeStruct((M, hidden), x.dtype))
        out_specs = (pl.BlockSpec((M, hidden), lambda g: (0, 0)),
                     pl.BlockSpec((M, hb), lambda g: (0, g)))
        # lnout block index is grid-invariant -> keep the axis "arbitrary".
        semantics = ("arbitrary",)
    else:
        out_shape = jax.ShapeDtypeStruct((M, hidden), x.dtype)
        out_specs = pl.BlockSpec((M, hb), lambda g: (0, g))
        semantics = ("parallel",)

    flops = 2 * M * hidden * 3 * hidden + 4 * num_heads * M * M * head_dim
    bytes_accessed = (hidden * 3 * hidden + 2 * M * hidden) * 2 + M * M * 4

    return pl.pallas_call(
        functools.partial(_qkv_attention_kernel, scale=scale,
                          heads_per_block=heads_per_block, head_dim=head_dim,
                          apply_ln=apply_ln, eps=eps),
        out_shape=out_shape,
        grid=(n_groups,),
        in_specs=in_specs,
        out_specs=out_specs,
        compiler_params=pltpu.CompilerParams(
            dimension_semantics=semantics, vmem_limit_bytes=_VMEM_LIMIT),
        cost_estimate=pl.CostEstimate(flops=flops, transcendentals=num_heads * M * M,
                                      bytes_accessed=bytes_accessed),
    )(*args)


# ----------------------------------------------------------------------------
# Attention-output dense + residual + LayerNorm (single grid step per M-tile)
# ----------------------------------------------------------------------------
def _dense_res_ln_kernel(x_ref, w_ref, b_ref, res_ref, g_ref, be_ref, o_ref, *, eps):
    y = jnp.dot(x_ref[...], w_ref[...], preferred_element_type=jnp.float32)
    y = y + b_ref[...] + res_ref[...].astype(jnp.float32)
    o_ref[...] = _ln_f32(y, g_ref[...], be_ref[...], eps).astype(o_ref.dtype)


def dense_residual_layernorm(x, w, b, residual, gamma, beta, *,
                             tile_m=None, eps=CFG["ln_eps"]):
    """y = LayerNorm(x @ w + b + residual). Whole (768,768) weight in one step;
    optional parallel M-tiling feeds v7x's second core once M is large."""
    M, K = x.shape
    N = w.shape[1]
    if tile_m is None or tile_m > M:
        tile_m = M
    assert M % tile_m == 0
    return pl.pallas_call(
        functools.partial(_dense_res_ln_kernel, eps=eps),
        out_shape=jax.ShapeDtypeStruct((M, N), x.dtype),
        grid=(M // tile_m,),
        in_specs=[
            pl.BlockSpec((tile_m, K), lambda m: (m, 0)),
            pl.BlockSpec((K, N), lambda m: (0, 0)),
            pl.BlockSpec((1, N), lambda m: (0, 0)),
            pl.BlockSpec((tile_m, N), lambda m: (m, 0)),
            pl.BlockSpec((1, N), lambda m: (0, 0)),
            pl.BlockSpec((1, N), lambda m: (0, 0)),
        ],
        out_specs=pl.BlockSpec((tile_m, N), lambda m: (m, 0)),
        compiler_params=pltpu.CompilerParams(
            dimension_semantics=("parallel",),
            vmem_limit_bytes=_VMEM_LIMIT),
    )(x, w, b.reshape(1, N), residual, gamma.reshape(1, N), beta.reshape(1, N))


# ----------------------------------------------------------------------------
# FFN: LN(gelu(x@w1+b1)@w2 + b2 + x), intermediate dim tiled on the grid
# ----------------------------------------------------------------------------
def _ffn_kernel(x_ref, w1_ref, b1_ref, w2_ref, b2_ref, g_ref, be_ref, o_ref,
                acc_ref, *, eps):
    i = pl.program_id(1)

    @pl.when(i == 0)
    def _():
        acc_ref[...] = jnp.zeros_like(acc_ref)

    h = jnp.dot(x_ref[...], w1_ref[...], preferred_element_type=jnp.float32)
    h = h + b1_ref[...]
    # TODO(synk): HF BERT uses exact (erf) GELU; tanh approximation used for
    # Mosaic-safe lowering.
    h = jax.nn.gelu(h, approximate=True)
    acc_ref[...] += jnp.dot(h.astype(w2_ref.dtype), w2_ref[...],
                            preferred_element_type=jnp.float32)

    @pl.when(i == pl.num_programs(1) - 1)
    def _():
        y = acc_ref[...] + b2_ref[...] + x_ref[...].astype(jnp.float32)
        o_ref[...] = _ln_f32(y, g_ref[...], be_ref[...], eps).astype(o_ref.dtype)


def ffn_residual_layernorm(x, w1, b1, w2, b2, gamma, beta, *,
                           tile_m=None, tile_i=1536, eps=CFG["ln_eps"]):
    """The (M, 3072) intermediate activation never leaves VMEM. tile_i=1536 keeps
    double-buffered w1/w2 blocks (~9 MB) well inside v7x's 64 MiB VMEM."""
    M, H = x.shape
    I = w1.shape[1]
    if tile_m is None or tile_m > M:
        tile_m = M
    assert M % tile_m == 0 and I % tile_i == 0
    flops = 4 * M * H * I
    bytes_accessed = 2 * H * I * 2 + 2 * M * H * 2 + (I + 3 * H) * 4
    return pl.pallas_call(
        functools.partial(_ffn_kernel, eps=eps),
        out_shape=jax.ShapeDtypeStruct((M, H), x.dtype),
        grid=(M // tile_m, I // tile_i),
        in_specs=[
            pl.BlockSpec((tile_m, H), lambda m, i: (m, 0)),
            pl.BlockSpec((H, tile_i), lambda m, i: (0, i)),
            pl.BlockSpec((1, tile_i), lambda m, i: (0, i)),
            pl.BlockSpec((tile_i, H), lambda m, i: (i, 0)),
            pl.BlockSpec((1, H), lambda m, i: (0, 0)),
            pl.BlockSpec((1, H), lambda m, i: (0, 0)),
            pl.BlockSpec((1, H), lambda m, i: (0, 0)),
        ],
        out_specs=pl.BlockSpec((tile_m, H), lambda m, i: (m, 0)),
        scratch_shapes=[pltpu.VMEM((tile_m, H), jnp.float32)],
        compiler_params=pltpu.CompilerParams(
            dimension_semantics=("parallel", "arbitrary"),
            vmem_limit_bytes=_VMEM_LIMIT),
        cost_estimate=pl.CostEstimate(flops=flops, transcendentals=M * I,
                                      bytes_accessed=bytes_accessed),
    )(x, w1, b1.reshape(1, I), w2, b2.reshape(1, H),
      gamma.reshape(1, H), beta.reshape(1, H))


# ----------------------------------------------------------------------------
# Fused pooler (tanh dense on CLS) + dropout(identity) + classifier
# ----------------------------------------------------------------------------
def _pooler_classifier_kernel(x_ref, pw_ref, pb_ref, cw_ref, cb_ref, o_ref):
    pooled = jnp.dot(x_ref[...], pw_ref[...], preferred_element_type=jnp.float32)
    pooled = jnp.tanh(pooled + pb_ref[...])
    # TODO(synk): dropout(0.2) on the pooled output is identity in eval mode;
    # training-mode dropout (PRNG mask) intentionally omitted.
    logits = jnp.dot(pooled.astype(cw_ref.dtype), cw_ref[...],
                     preferred_element_type=jnp.float32) + cb_ref[...]
    o_ref[...] = logits


def pooler_classifier(cls_tok, pw, pb, cw_pad, cb_pad):
    """Fused BERT pooler (tanh dense) + classifier; class dim pre-padded to 128."""
    B, H = cls_tok.shape
    Np = cw_pad.shape[1]
    return pl.pallas_call(
        _pooler_classifier_kernel,
        out_shape=jax.ShapeDtypeStruct((B, Np), jnp.float32),
        grid=(1,),
        in_specs=[
            pl.BlockSpec((B, H), lambda i: (0, 0)),
            pl.BlockSpec((H, H), lambda i: (0, 0)),
            pl.BlockSpec((1, H), lambda i: (0, 0)),
            pl.BlockSpec((H, Np), lambda i: (0, 0)),
            pl.BlockSpec((1, Np), lambda i: (0, 0)),
        ],
        out_specs=pl.BlockSpec((B, Np), lambda i: (0, 0)),
        compiler_params=pltpu.CompilerParams(vmem_limit_bytes=_VMEM_LIMIT),
    )(cls_tok, pw, pb.reshape(1, H), cw_pad, cb_pad.reshape(1, Np))


# ----------------------------------------------------------------------------
# Parameter init (deterministic, synthetic). Weights bf16, biases/LN params f32.
# ----------------------------------------------------------------------------
def _pack_qkv(wq, wk, wv, heads_per_block, head_dim):
    """Column-pack Wq/Wk/Wv into per-head-group layout [Q_g | K_g | V_g]."""
    hb = heads_per_block * head_dim
    n_groups = wq.shape[1] // hb
    blocks = []
    for g in range(n_groups):
        sl = slice(g * hb, (g + 1) * hb)
        blocks += [wq[:, sl], wk[:, sl], wv[:, sl]]
    return jnp.concatenate(blocks, axis=1)


def init_params(key, cfg):
    H = cfg["hidden"]
    I = cfg["intermediate"]
    C = cfg["n_classes"]
    hpb = LANES // cfg["head_dim"]
    n_pad = ((C + LANES - 1) // LANES) * LANES

    def nrm_f32(k, shape, std=0.02):
        return jax.random.normal(k, shape, dtype=jnp.float32) * std

    def nrm(k, shape, std=0.02):
        return nrm_f32(k, shape, std).astype(COMPUTE_DTYPE)

    keys = iter(jax.random.split(key, 16 + cfg["num_layers"] * 16))
    p = dict(
        word_emb=nrm(next(keys), (cfg["vocab_size"], H)),
        pos_emb=nrm(next(keys), (cfg["max_position"], H)),
        type_emb=nrm(next(keys), (cfg["type_vocab_size"], H)),
        emb_ln_g=jnp.ones((H,), jnp.float32),
        emb_ln_b=jnp.zeros((H,), jnp.float32),
        pooler_w=nrm(next(keys), (H, H)),
        pooler_b=jnp.zeros((H,), jnp.float32),
        cls_w=jnp.pad(nrm_f32(next(keys), (H, C)),
                      ((0, 0), (0, n_pad - C))).astype(COMPUTE_DTYPE),
        cls_b=jnp.zeros((n_pad,), jnp.float32),
        layers=[],
    )
    for _ in range(cfg["num_layers"]):
        wq = nrm_f32(next(keys), (H, H))
        wk = nrm_f32(next(keys), (H, H))
        wv = nrm_f32(next(keys), (H, H))
        qkv_w = _pack_qkv(wq, wk, wv, hpb, cfg["head_dim"]).astype(COMPUTE_DTYPE)
        p["layers"].append(dict(
            qkv_w=qkv_w, qkv_b=jnp.zeros((3 * H,), jnp.float32),
            ao_w=nrm(next(keys), (H, H)), ao_b=jnp.zeros((H,), jnp.float32),
            attn_ln_g=jnp.ones((H,), jnp.float32),
            attn_ln_b=jnp.zeros((H,), jnp.float32),
            ff1_w=nrm(next(keys), (H, I)), ff1_b=jnp.zeros((I,), jnp.float32),
            ff2_w=nrm(next(keys), (I, H)), ff2_b=jnp.zeros((H,), jnp.float32),
            out_ln_g=jnp.ones((H,), jnp.float32),
            out_ln_b=jnp.zeros((H,), jnp.float32),
        ))
    return p


# ----------------------------------------------------------------------------
# Forward pass (== OneLevelBertClassifier.forward, eval mode)
# ----------------------------------------------------------------------------
def one_level_bert_classifier_forward(params, ids, mask, token_type_ids, cfg=CFG):
    B, S = ids.shape
    H = cfg["hidden"]
    nh, hd = cfg["num_heads"], cfg["head_dim"]
    M = B * S
    # TODO(synk): for production batch/seq sizes pad M (= B*S) to >=128, pass a
    # tile_m to the reduction kernels (parallel M axis), and replace the flat
    # (M, M) bias with a batch grid axis + (B, S) key mask so cross-batch
    # attention FLOPs are not wasted.

    # --- embeddings (gathers are glue); LN is folded into the first QKV kernel ---
    pos = jnp.arange(S, dtype=jnp.int32)
    x = (jnp.take(params["word_emb"], ids, axis=0)
         + jnp.take(params["pos_emb"], pos, axis=0)[None, :, :]
         + jnp.take(params["type_emb"], token_type_ids, axis=0))
    x = x.reshape(M, H).astype(COMPUTE_DTYPE)

    # --- combined additive attention bias: key padding + batch block-diagonal ---
    # (batches are stacked along rows, so cross-batch attention is masked out;
    #  -10000 underflows to exactly 0 after softmax, matching HF semantics.)
    mask_f = mask.reshape(M).astype(jnp.float32)
    batch_ids = jnp.repeat(jnp.arange(B, dtype=jnp.int32), S)
    same_batch = (batch_ids[:, None] == batch_ids[None, :]).astype(jnp.float32)
    bias2d = (1.0 - same_batch * mask_f[None, :]) * -10000.0     # (M, M) f32

    # --- transformer encoder layers ---
    for li, layer in enumerate(params["layers"]):
        if li == 0:
            # Embedding LayerNorm fused into the first QKV+attention kernel;
            # the normalized x also comes back as the residual for this layer.
            x, ctx = qkv_attention(x, layer["qkv_w"], layer["qkv_b"], bias2d,
                                   num_heads=nh, head_dim=hd, hidden=H,
                                   ln_gamma=params["emb_ln_g"],
                                   ln_beta=params["emb_ln_b"])
        else:
            ctx = qkv_attention(x, layer["qkv_w"], layer["qkv_b"], bias2d,
                                num_heads=nh, head_dim=hd, hidden=H)
        x = dense_residual_layernorm(ctx, layer["ao_w"], layer["ao_b"],
                                     x, layer["attn_ln_g"], layer["attn_ln_b"])
        x = ffn_residual_layernorm(x, layer["ff1_w"], layer["ff1_b"],
                                   layer["ff2_w"], layer["ff2_b"],
                                   layer["out_ln_g"], layer["out_ln_b"])

    # --- BERT pooler (tanh dense on CLS) + dropout(identity) + classifier ---
    cls_tok = x.reshape(B, S, H)[:, 0, :]                             # (B, 768)
    logits_pad = pooler_classifier(cls_tok, params["pooler_w"],
                                   params["pooler_b"],
                                   params["cls_w"], params["cls_b"])  # (B, 128)
    return logits_pad[:, :cfg["n_classes"]]


# ----------------------------------------------------------------------------
if __name__ == "__main__":
    key = jax.random.PRNGKey(0)
    pkey, ikey = jax.random.split(key)

    params = init_params(pkey, CFG)

    B, S = 2, 8
    ids = jax.random.randint(ikey, (B, S), 0, CFG["vocab_size"], dtype=jnp.int32)
    mask = jnp.ones((B, S), dtype=jnp.int32).at[1, 6:].set(0)   # pad last tokens of row 1
    token_type_ids = jnp.zeros((B, S), dtype=jnp.int32)

    logits = one_level_bert_classifier_forward(params, ids, mask, token_type_ids)
    logits = jax.block_until_ready(logits)

    assert logits.shape == (B, CFG["n_classes"])
    assert jnp.all(jnp.isfinite(logits))
    print("KERNEL_OK")
</pallas_src>

<mosaic_0001>
module attributes {stable_mosaic.version = 11 : i64} {
  func.func @_qkv_attention_kernel(%arg0: i32, %arg1: memref<16x768xbf16, #tpu.memory_space<vmem>>, %arg2: memref<768x384xbf16, #tpu.memory_space<vmem>>, %arg3: memref<1x384xf32, #tpu.memory_space<vmem>>, %arg4: memref<16x16xf32, #tpu.memory_space<vmem>>, %arg5: memref<1x768xf32, #tpu.memory_space<vmem>>, %arg6: memref<1x768xf32, #tpu.memory_space<vmem>>, %arg7: memref<16x768xbf16, #tpu.memory_space<vmem>>, %arg8: memref<16x128xbf16, #tpu.memory_space<vmem>>) attributes {dimension_semantics = [#tpu.dimension_semantics<arbitrary>], iteration_bounds = array<i64: 6>, scalar_prefetch = 0 : i64, scratch_operands = 0 : i64, tpu.core_type = #tpu.core_type<tc>, window_params = [{pipeline_mode = #tpu.pipeline_mode<synchronous>, transform_indices = @transform_0, window_bounds = array<i64: 16, 768>}, {transform_indices = @transform_1, window_bounds = array<i64: 768, 384>}, {transform_indices = @transform_2, window_bounds = array<i64: 1, 384>}, {pipeline_mode = #tpu.pipeline_mode<synchronous>, transform_indices = @transform_3, window_bounds = array<i64: 16, 16>}, {pipeline_mode = #tpu.pipeline_mode<synchronous>, transform_indices = @transform_4, window_bounds = array<i64: 1, 768>}, {pipeline_mode = #tpu.pipeline_mode<synchronous>, transform_indices = @transform_5, window_bounds = array<i64: 1, 768>}, {pipeline_mode = #tpu.pipeline_mode<synchronous>, transform_indices = @transform_6, window_bounds = array<i64: 16, 768>}, {transform_indices = @transform_7, window_bounds = array<i64: 16, 128>}]} {
    %c0 = arith.constant 0 : index
    %c0_0 = arith.constant 0 : index
    %0 = vector.load %arg1[%c0, %c0_0] : memref<16x768xbf16, #tpu.memory_space<vmem>>, vector<16x768xbf16>
    %1 = arith.extf %0 : vector<16x768xbf16> to vector<16x768xf32>
    %c0_1 = arith.constant 0 : index
    %c0_2 = arith.constant 0 : index
    %2 = vector.load %arg5[%c0_1, %c0_2] : memref<1x768xf32, #tpu.memory_space<vmem>>, vector<1x768xf32>
    %c0_3 = arith.constant 0 : index
    %c0_4 = arith.constant 0 : index
    %3 = vector.load %arg6[%c0_3, %c0_4] : memref<1x768xf32, #tpu.memory_space<vmem>>, vector<1x768xf32>
    %cst = arith.constant dense<0.000000e+00> : vector<16xf32>
    %4 = vector.multi_reduction <add>, %1, %cst [1] : vector<16x768xf32> to vector<16xf32>
    %5 = vector.shape_cast %4 : vector<16xf32> to vector<16x1xf32>
    %cst_5 = arith.constant 7.680000e+02 : f32
    %6 = vector.broadcast %cst_5 : f32 to vector<16x1xf32>
    %7 = arith.divf %5, %6 : vector<16x1xf32>
    %8 = vector.broadcast %7 : vector<16x1xf32> to vector<16x768xf32>
    %9 = arith.subf %1, %8 : vector<16x768xf32>
    %10 = arith.mulf %9, %9 : vector<16x768xf32>
    %cst_6 = arith.constant dense<0.000000e+00> : vector<16xf32>
    %11 = vector.multi_reduction <add>, %10, %cst_6 [1] : vector<16x768xf32> to vector<16xf32>
    %12 = vector.shape_cast %11 : vector<16xf32> to vector<16x1xf32>
    %cst_7 = arith.constant 7.680000e+02 : f32
    %13 = vector.broadcast %cst_7 : f32 to vector<16x1xf32>
    %14 = arith.divf %12, %13 : vector<16x1xf32>
    %15 = vector.broadcast %7 : vector<16x1xf32> to vector<16x768xf32>
    %16 = arith.subf %1, %15 : vector<16x768xf32>
    %cst_8 = arith.constant 9.99999996E-13 : f32
    %17 = vector.broadcast %cst_8 : f32 to vector<16x1xf32>
    %18 = arith.addf %14, %17 : vector<16x1xf32>
    %19 = math.rsqrt %18 : vector<16x1xf32>
    %20 = vector.broadcast %19 : vector<16x1xf32> to vector<16x768xf32>
    %21 = arith.mulf %16, %20 : vector<16x768xf32>
    %22 = vector.broadcast %2 : vector<1x768xf32> to vector<16x768xf32>
    %23 = arith.mulf %21, %22 : vector<16x768xf32>
    %24 = vector.broadcast %3 : vector<1x768xf32> to vector<16x768xf32>
    %25 = arith.addf %23, %24 : vector<16x768xf32>
    %26 = arith.truncf %25 : vector<16x768xf32> to vector<16x768xbf16>
    %c0_9 = arith.constant 0 : index
    %c0_10 = arith.constant 0 : index
    %27 = vector.load %arg7[%c0_9, %c0_10] : memref<16x768xbf16, #tpu.memory_space<vmem>>, vector<16x768xbf16>
    tpu.vector_store %arg7[%c0_9, %c0_10], %26 {strides = array<i32>} : memref<16x768xbf16, #tpu.memory_space<vmem>>, vector<16x768xbf16>,
    %28 = arith.truncf %25 : vector<16x768xf32> to vector<16x768xbf16>
    %c0_11 = arith.constant 0 : index
    %c0_12 = arith.constant 0 : index
    %29 = vector.load %arg2[%c0_11, %c0_12] : memref<768x384xbf16, #tpu.memory_space<vmem>>, vector<768x384xbf16>
    %cst_13 = arith.constant dense<0.000000e+00> : vector<16x384xf32>
    %30 = tpu.matmul %28, %29, %cst_13 {dimension_numbers = #tpu.dot_dimension_numbers<[1], [0], [0], [1], [0, 0, 1, 1], [], []>} : vector<16x768xbf16>, vector<768x384xbf16>, vector<16x384xf32> -> vector<16x384xf32>
    %c0_14 = arith.constant 0 : index
    %c0_15 = arith.constant 0 : index
    %31 = vector.load %arg3[%c0_14, %c0_15] : memref<1x384xf32, #tpu.memory_space<vmem>>, vector<1x384xf32>
    %32 = vector.broadcast %31 : vector<1x384xf32> to vector<16x384xf32>
    %33 = arith.addf %30, %32 : vector<16x384xf32>
    %c0_16 = arith.constant 0 : index
    %c0_17 = arith.constant 0 : index
    %34 = vector.load %arg4[%c0_16, %c0_17] : memref<16x16xf32, #tpu.memory_space<vmem>>, vector<16x16xf32>
    %35 = vector.extract_strided_slice %33 {offsets = [0, 0], sizes = [16, 64], strides = [1, 1]} : vector<16x384xf32> to vector<16x64xf32>
    %36 = vector.extract_strided_slice %33 {offsets = [0, 128], sizes = [16, 64], strides = [1, 1]} : vector<16x384xf32> to vector<16x64xf32>
    %37 = vector.extract_strided_slice %33 {offsets = [0, 256], sizes = [16, 64], strides = [1, 1]} : vector<16x384xf32> to vector<16x64xf32>
    %cst_18 = arith.constant dense<0.000000e+00> : vector<16x16xf32>
    %38 = tpu.matmul %35, %36, %cst_18 {dimension_numbers = #tpu.dot_dimension_numbers<[1], [1], [0], [0], [0, 0, 1, 0], [], []>} : vector<16x64xf32>, vector<16x64xf32>, vector<16x16xf32> -> vector<16x16xf32>
    %cst_19 = arith.constant 1.250000e-01 : f32
    %39 = vector.broadcast %cst_19 : f32 to vector<16x16xf32>
    %40 = arith.mulf %38, %39 : vector<16x16xf32>
    %41 = arith.addf %40, %34 : vector<16x16xf32>
    %cst_20 = arith.constant dense<0xFF800000> : vector<16xf32>
    %42 = vector.multi_reduction <maximumf>, %41, %cst_20 [1] : vector<16x16xf32> to vector<16xf32>
    %43 = vector.shape_cast %42 : vector<16xf32> to vector<16x1xf32>
    %44 = vector.broadcast %43 : vector<16x1xf32> to vector<16x16xf32>
    %45 = arith.subf %41, %44 : vector<16x16xf32>
    %46 = math.exp %45 : vector<16x16xf32>
    %cst_21 = arith.constant dense<0.000000e+00> : vector<16xf32>
    %47 = vector.multi_reduction <add>, %46, %cst_21 [1] : vector<16x16xf32> to vector<16xf32>
    %48 = vector.shape_cast %47 : vector<16xf32> to vector<16x1xf32>
    %49 = tpu.reciprocal %48 {approx = true} : vector<16x1xf32> -> vector<16x1xf32>
    %50 = vector.broadcast %49 : vector<16x1xf32> to vector<16x16xf32>
    %51 = arith.mulf %46, %50 : vector<16x16xf32>
    %52 = arith.truncf %51 : vector<16x16xf32> to vector<16x16xbf16>
    %53 = arith.truncf %37 : vector<16x64xf32> to vector<16x64xbf16>
    %cst_22 = arith.constant dense<0.000000e+00> : vector<16x64xf32>
    %54 = tpu.matmul %52, %53, %cst_22 {dimension_numbers = #tpu.dot_dimension_numbers<[1], [0], [0], [1], [0, 0, 1, 1], [], []>} : vector<16x16xbf16>, vector<16x64xbf16>, vector<16x64xf32> -> vector<16x64xf32>
    %55 = vector.extract_strided_slice %33 {offsets = [0, 64], sizes = [16, 64], strides = [1, 1]} : vector<16x384xf32> to vector<16x64xf32>
    %56 = vector.extract_strided_slice %33 {offsets = [0, 192], sizes = [16, 64], strides = [1, 1]} : vector<16x384xf32> to vector<16x64xf32>
    %57 = vector.extract_strided_slice %33 {offsets = [0, 320], sizes = [16, 64], strides = [1, 1]} : vector<16x384xf32> to vector<16x64xf32>
    %cst_23 = arith.constant dense<0.000000e+00> : vector<16x16xf32>
    %58 = tpu.matmul %55, %56, %cst_23 {dimension_numbers = #tpu.dot_dimension_numbers<[1], [1], [0], [0], [0, 0, 1, 0], [], []>} : vector<16x64xf32>, vector<16x64xf32>, vector<16x16xf32> -> vector<16x16xf32>
    %cst_24 = arith.constant 1.250000e-01 : f32
    %59 = vector.broadcast %cst_24 : f32 to vector<16x16xf32>
    %60 = arith.mulf %58, %59 : vector<16x16xf32>
    %61 = arith.addf %60, %34 : vector<16x16xf32>
    %cst_25 = arith.constant dense<0xFF800000> : vector<16xf32>
    %62 = vector.multi_reduction <maximumf>, %61, %cst_25 [1] : vector<16x16xf32> to vector<16xf32>
    %63 = vector.shape_cast %62 : vector<16xf32> to vector<16x1xf32>
    %64 = vector.broadcast %63 : vector<16x1xf32> to vector<16x16xf32>
    %65 = arith.subf %61, %64 : vector<16x16xf32>
    %66 = math.exp %65 : vector<16x16xf32>
    %cst_26 = arith.constant dense<0.000000e+00> : vector<16xf32>
    %67 = vector.multi_reduction <add>, %66, %cst_26 [1] : vector<16x16xf32> to vector<16xf32>
    %68 = vector.shape_cast %67 : vector<16xf32> to vector<16x1xf32>
    %69 = tpu.reciprocal %68 {approx = true} : vector<16x1xf32> -> vector<16x1xf32>
    %70 = vector.broadcast %69 : vector<16x1xf32> to vector<16x16xf32>
    %71 = arith.mulf %66, %70 : vector<16x16xf32>
    %72 = arith.truncf %71 : vector<16x16xf32> to vector<16x16xbf16>
    %73 = arith.truncf %57 : vector<16x64xf32> to vector<16x64xbf16>
    %cst_27 = arith.constant dense<0.000000e+00> : vector<16x64xf32>
    %74 = tpu.matmul %72, %73, %cst_27 {dimension_numbers = #tpu.dot_dimension_numbers<[1], [0], [0], [1], [0, 0, 1, 1], [], []>} : vector<16x16xbf16>, vector<16x64xbf16>, vector<16x64xf32> -> vector<16x64xf32>
    %75 = tpu.concatenate %54, %74 in 1 : vector<16x64xf32>, vector<16x64xf32> -> vector<16x128xf32>
    %76 = arith.truncf %75 : vector<16x128xf32> to vector<16x128xbf16>
    %c0_28 = arith.constant 0 : index
    %c0_29 = arith.constant 0 : index
    %77 = vector.load %arg8[%c0_28, %c0_29] : memref<16x128xbf16, #tpu.memory_space<vmem>>, vector<16x128xbf16>
    tpu.vector_store %arg8[%c0_28, %c0_29], %76 {strides = array<i32>} : memref<16x128xbf16, #tpu.memory_space<vmem>>, vector<16x128xbf16>,
    return
  }
  func.func @transform_0(%arg0: i32) -> (i32, i32) {
    %c0_i32 = arith.constant 0 : i32
    %c0_i32_0 = arith.constant 0 : i32
    %c0_i32_1 = arith.constant 0 : i32
    return %c0_i32, %c0_i32_0 : i32, i32
  }
  func.func @transform_1(%arg0: i32) -> (i32, i32) {
    %c0_i32 = arith.constant 0 : i32
    %c0_i32_0 = arith.constant 0 : i32
    return %c0_i32, %arg0 : i32, i32
  }
  func.func @transform_2(%arg0: i32) -> (i32, i32) {
    %c0_i32 = arith.constant 0 : i32
    %c0_i32_0 = arith.constant 0 : i32
    return %c0_i32, %arg0 : i32, i32
  }
  func.func @transform_3(%arg0: i32) -> (i32, i32) {
    %c0_i32 = arith.constant 0 : i32
    %c0_i32_0 = arith.constant 0 : i32
    %c0_i32_1 = arith.constant 0 : i32
    return %c0_i32, %c0_i32_0 : i32, i32
  }
  func.func @transform_4(%arg0: i32) -> (i32, i32) {
    %c0_i32 = arith.constant 0 : i32
    %c0_i32_0 = arith.constant 0 : i32
    %c0_i32_1 = arith.constant 0 : i32
    return %c0_i32, %c0_i32_0 : i32, i32
  }
  func.func @transform_5(%arg0: i32) -> (i32, i32) {
    %c0_i32 = arith.constant 0 : i32
    %c0_i32_0 = arith.constant 0 : i32
    %c0_i32_1 = arith.constant 0 : i32
    return %c0_i32, %c0_i32_0 : i32, i32
  }
  func.func @transform_6(%arg0: i32) -> (i32, i32) {
    %c0_i32 = arith.constant 0 : i32
    %c0_i32_0 = arith.constant 0 : i32
    %c0_i32_1 = arith.constant 0 : i32
    return %c0_i32, %c0_i32_0 : i32, i32
  }
  func.func @transform_7(%arg0: i32) -> (i32, i32) {
    %c0_i32 = arith.constant 0 : i32
    %c0_i32_0 = arith.constant 0 : i32
    return %c0_i32, %arg0 : i32, i32
  }
}

</mosaic_0001>

<bundles_post_ra>
// kernel: tpu_custom_call.1
= control target key start
LH: loop header
LB: loop body
LE: loop exit
PB: predicated region body
PF: predicated region fallthrough
CT: control target
= control target key end

     0   :  { %s4164_s0 = inlined_call_operand.hbm [shape: bf16[16,768], index: 0, kind: input, shape index: {}]   ;;  %s4165_s1 = inlined_call_operand.hbm [shape: bf16[768,2304], index: 1, kind: input, shape index: {}]   ;;  %s4166_s2 = inlined_call_operand.hbm [shape: f32[1,2304], index: 2, kind: input, shape index: {}]   ;;  %s4167_s3 = inlined_call_operand.hbm [shape: f32[16,16], index: 3, kind: input, shape index: {}]   ;;  %s4168_s4 = inlined_call_operand.hbm [shape: f32[1,768], index: 4, kind: input, shape index: {}]   ;;  %s4169_s5 = inlined_call_operand.hbm [shape: f32[1,768], index: 5, kind: input, shape index: {}]   ;;  %s4170_s6 = inlined_call_operand.hbm [shape: bf16[16,768], index: 6, kind: output, shape index: {0}]   ;;  %s4171_s7 = inlined_call_operand.hbm [shape: bf16[16,768], index: 7, kind: output, shape index: {1}]  }
   0x1   :  { %4179 = sst [smem:[#allocation26_spill]] %s4165_s1 }
   0x2   :  { %4180 = sst [smem:[#allocation27_spill]] %s4167_s3 }
   0x3   :  { %13 = vsyncpa [#allocation3], 0 }
   0x4   :  { %14 = vsyncpa [#allocation6], 0 }
   0x5   :  { %16 = vsyncpa [#allocation6 + $0x1], 0 }
   0x6   :  { %17 = vsyncpa [#allocation9], 0 }
   0x7   :  { %18 = vsyncpa [#allocation12], 0 }
   0x8   :  { %19 = vsyncpa [#allocation4], 0 }
   0x9   :  { %20 = vsyncpa [#allocation15], 0 }
   0xa   :  { %22 = vsyncpa [#allocation15 + $0x1], 0  ;;  %s3438_s24 = smov 0   ;;  %s3440_s25 = smov 0  }
   0xb   :  { %s3442_s26 = smov 0   ;;  %s3444_s27 = smov 0  }
   0xc LB: > { %4181 = sst [smem:[#allocation22_spill]] %s3367_s24  ;;  %s3459_s28 = sadd.s32 4294967295, %s3379_s27   ;;  %s3379_s27 = sphi %s3444_s27, %s4205_s27   ;;  %s3375_s26 = sphi %s3442_s26, %s4209_s26   ;;  %s3371_s25 = sphi %s3440_s25, %s4208_s25   ;;  %s3367_s24 = sphi %s3438_s24, %s4207_s24  }
   0xd   : > { %s2191_s29 = sadd.s32 4294967294, %s3379_s27   ;;  %p69_p0 = scmp.ne.s32.totalorder %s3371_s25, %s3367_s24 }
   0xe   : > { %p4174_p1 = scmp.eq.s32.totalorder %s3459_s28, 0  ;;  %p4173_p2 = scmp.eq.s32.totalorder %s3459_s28, 5 }
   0xf   : > { %p209_p3 = scmp.eq.s32.totalorder %s2191_s29, 5  ;;  %p2192_p5 = scmp.ge.s32.totalorder %s3379_s27, 1 }
  0x10   : > { %p3468_p4 = por %p4174_p1, %p69_p0  ;;  %p216_p7 = scmp.lt.s32.totalorder %s3379_s27, 7 }
  0x11   : > { %p3473_p6 = por %p209_p3, %p69_p0  ;;  %s4185_s3 = sld [smem:[#allocation27_spill]] }
  0x12   : > { %p3481_p8 = pnand %p2192_p5, %p216_p7  ;;  %s3381_s13 = smov [#allocation8]  }
  0x13   : > { %s4183_s8 = scalar_select %p3473_p6, 1, 0 }
  0x14   : > { %p2977_p9 = pneg %p3481_p8  ;;  %s243_s14 = sshll.u32 %s3381_s13, 4  ;;  %s244_s14 = int_to_ptr.vmem [resolvable:$true] %s243_s14 }
  0x15   : > { %4184 = sst [smem:[#allocation23_spill]] %s4183_s8  ;;  %s3494_s16 = sadd.s32 1, %s3379_s27  }
  0x16   : > { %p3489_p10 = pnand %p2977_p9, %p4174_p1  ;;  %4188 = sst [smem:[#allocation24_spill]] %s3494_s16 }
  0x17   : > { %s241_s11 = sshll.u32 %s4185_s3, 4  ;;  %s3382_s17 = smov 128   ;;  %s242_s11 = int_to_ptr.hbm [resolvable:$true] %s241_s11 }
  0x18   : > { %s3383_s18 = smov 8   ;;  %s53_s19 = ssub.s32 %s3379_s27, %s3494_s16 }
  0x19   : > { %2983 = dma.hbm_to_vmem [thread:$0]  (!%p3489_p10), %s242_s11, 256, %s244_s14, [#allocation9], %s3382_s17, %s3382_s17, %s3383_s18  }
  0x1a   : > { %s56_s20 = sadd.s32 1, %s3375_s26  ;;  %p54_p11 = scmp.eq.s32.totalorder %s53_s19, 0 }
  0x1b   : > { %p63_p12 = scmp.ne.s32.totalorder %s3375_s26, %s3371_s25  ;;  %p64_p13 = scmp.eq.s32.totalorder %s3379_s27, 0 }
  0x1c   : > { %p3005_p0 = scmp.lt.s32.totalorder %s3379_s27, 6  ;;  %s281_s23 = sand.u32 1, %s3379_s27  }
  0x1d   : > { %s3506_s21 = scalar_select %p54_p11, %s3375_s26, %s56_s20  }
  0x1e   : > { %p65_p3 = por %p64_p13, %p63_p12  ;;  %p3510_p5 = por %p4173_p2, %p63_p12 }
  0x1f   : > { %4189 = sst [smem:[#allocation25_spill]] %s3506_s21  ;;  %s4172_s29 = sand.u32 1, %s3375_s26  }
  0x20   : > { %s2947_s9 = smul.u32 1152, %s4172_s29  ;;  %p3519_p7 = pnand %p3005_p0, %p65_p3 }
  0x21   : > { %s2797_s10 = smul.u32 12, %s3379_s27  ;;  %s4192_s1 = sld [smem:[#allocation26_spill]] }
  0x22   : > { %s285_s18 = scalar_lea.vmem [#allocation5], %s2947_s9  ;;  %s3526_s3 = scalar_lea.sflag [#allocation6], %s281_s23 }
  0x23   : > { %s293_s19 = sshll.u32 %s285_s18, 4  ;;  %p3123_p11 = pneg %p3519_p7  ;;  %s294_s19 = int_to_ptr.vmem [resolvable:$true] %s293_s19 }
  0x27   : > { %s290_s17 = scalar_lea.hbm %s4192_s1, %s2797_s10  ;;  %s3126_s9 = scalar_lea.hbm %s4192_s1, 6912 }
  0x28   : > { %s291_s20 = sshll.u32 %s290_s17, 4  ;;  %s292_s20 = int_to_ptr.hbm [resolvable:$true] %s291_s20 }
  0x29   : > { %s3119_s21 = sshra.s32 %s292_s20, 4  ;;  %s3120_s21 = int_to_ptr.hbm [resolvable:$true] %s3119_s21 }
  0x2a   : > { %s3121_s29 = scalar_lea.hbm %s3120_s21, 1152  ;;  %p3127_p0 = scmp.lt.s32.totalorder %s3120_s21, %s4192_s1 }
  0x2b   : > { %p3122_p9 = scmp.ne.s32.totalorder %s3120_s21, %s3121_s29  ;;  %p3128_p3 = scmp.lt.s32.totalorder %s3126_s9, %s3121_s29 }
  0x2d   : > { %p3124_p12 = pnand %p3123_p11, %p3122_p9  ;;  %p3129_p2 = por %p3128_p3, %p3127_p0 }
  0x2f   : > { %p3125_p13 = pneg %p3124_p12 }
  0x31   : > { %p3130_p1 = pnand %p3129_p2, %p3125_p13 }
  0x33   : > { %3133 = shalt.err (!%p3130_p1)
}
  0x34   : > { %s3384_s23 = smov 1152   ;;  %s3385_s18 = smov 192  }
  0x35   : > { %s3386_s16 = smov 12   ;;  %s227_s13 = sshll.u32 %s4164_s0, 4  ;;  %s228_s13 = int_to_ptr.hbm [resolvable:$true] %s227_s13 }
  0x36   : > { %2993 = dma.hbm_to_vmem [thread:$0]  (!%p3519_p7), %s292_s20, 18432, %s294_s19, %s3526_s3, %s3384_s23, %s3385_s18, %s3386_s16  }
  0x37   : > { %s3387_s21 = smov [#allocation2]   ;;  %s256_s10 = sshll.u32 %s4168_s4, 4  ;;  %s257_s10 = int_to_ptr.hbm [resolvable:$true] %s256_s10 }
  0x38   : > { %s229_s29 = sshll.u32 %s3387_s21, 4  ;;  %s3388_s17 = smov 384   ;;  %s230_s29 = int_to_ptr.vmem [resolvable:$true] %s229_s29 }
  0x39   : > { %s3389_s1 = smov 24   ;;  %s3390_s16 = smov [#allocation10]  }
  0x3a   : > { %2980 = dma.hbm_to_vmem [thread:$0]  (!%p3489_p10), %s228_s13, 768, %s230_s29, [#allocation3], %s3388_s17, %s3388_s17, %s3389_s1  }
  0x3b   : > { %s258_s24 = sshll.u32 %s3390_s16, 4  ;;  %s268_s20 = sshll.u32 %s4169_s5, 4  ;;  %s259_s24 = int_to_ptr.vmem [resolvable:$true] %s258_s24  ;;  %s269_s20 = int_to_ptr.hbm [resolvable:$true] %s268_s20 }
  0x3c   : > { %2986 = dma.hbm_to_vmem [thread:$0]  (!%p3489_p10), %s257_s10, 96, %s259_s24, [#allocation9]  }
  0x3d   : > { %s4193_s23 = sand.u32 1, %s3375_s26   ;;  %s3391_s21 = smov [#allocation11]  }
  0x3e   : > { %s2948_s18 = smul.u32 3, %s4193_s23  ;;  %s270_s14 = sshll.u32 %s3391_s21, 4  ;;  %s271_s14 = int_to_ptr.vmem [resolvable:$true] %s270_s14 }
  0x3f   : > { %s308_s9 = smul.u32 3, %s3379_s27 }
  0x40   : > { %2989 = dma.hbm_to_vmem [thread:$0]  (!%p3489_p10), %s269_s20, 96, %s271_s14, [#allocation12]  }
  0x41   : > { %s311_s29 = scalar_lea.hbm %s4166_s2, %s308_s9  ;;  %s307_s17 = scalar_lea.vmem [#allocation7], %s2948_s18 }
  0x42   : > { %s315_s16 = sshll.u32 %s307_s17, 4  ;;  %s313_s8 = sshll.u32 %s311_s29, 4  ;;  %s316_s16 = int_to_ptr.vmem [resolvable:$true] %s315_s16  ;;  %s314_s8 = int_to_ptr.hbm [resolvable:$true] %s313_s8 }
  0x43   : > { %s3239_s19 = sshra.s32 %s314_s8, 4  ;;  %s3246_s20 = scalar_lea.hbm %s4166_s2, 18  ;;  %s3240_s19 = int_to_ptr.hbm [resolvable:$true] %s3239_s19 }
  0x44   : > { %s3241_s10 = scalar_lea.hbm %s3240_s19, 3  ;;  %p3247_p10 = scmp.lt.s32.totalorder %s3240_s19, %s4166_s2 }
  0x45   : > { %p3242_p1 = scmp.ne.s32.totalorder %s3240_s19, %s3241_s10  ;;  %p3248_p12 = scmp.lt.s32.totalorder %s3246_s20, %s3241_s10 }
  0x47   : > { %p3244_p2 = pnand %p3242_p1, %p3123_p11  ;;  %p3249_p13 = por %p3248_p12, %p3247_p10 }
  0x49   : > { %p3245_p9 = pneg %p3244_p2 }
  0x4b   : > { %p3250_p0 = pnand %p3249_p13, %p3245_p9 }
  0x4d   : > { %3253 = shalt.err (!%p3250_p0)
}
  0x4e   : > { %2996 = dma.hbm_to_vmem [thread:$0]  (!%p3519_p7), %s314_s8, 48, %s316_s16, %s3526_s3  }
  0x4f   : > { %324 = sbr.rel (%p3481_p8) target bundleno = 1351 (0x547), region = 44  ;;  %p4194_p11 = scmp.eq.s32.totalorder (!%p3481_p8), %s3459_s28, 0 }
  0x54   : > { %3342 = dma.done.wait (%p4194_p11), [#allocation3], 768   ;;  %p4195_p3 = pmov %p4194_p11 }
  0x55   : > { %s331_s18 = sand.u32 1, %s3459_s28   ;;  %s3583_s14 = sand.u32 1, %s3371_s25  }
  0x56   : > { %3344 = vsyncadd (%p4195_p3), [#allocation3], 4294966528  ;;  %s2949_s9 = smul.u32 1152, %s3583_s14  ;;  %s332_s11 = scalar_lea.sflag [#allocation6], %s331_s18 }
  0x58   : > { %s3586_s1 = scalar_lea.vmem [#allocation5], %s2949_s9 }
  0x59   : > { %3346 = dma.done.wait (%p3468_p4), %s332_s11, 18480  }
  0x5a   : > { %3348 = vsyncadd (%p3468_p4), %s332_s11, 4294948816  ;;  %s2950_s3 = smul.u32 3, %s3583_s14  ;;  %p4196_p8 = pmov %p4195_p3 }
  0x5c   : > { %s3593_s12 = scalar_lea.vmem [#allocation7], %s2950_s3 }
  0x5d   : > { %3350 = dma.done.wait (%p4196_p8), [#allocation9], 352   ;;  %p4197_p7 = pmov %p4195_p3 }
  0x5e   : > { %p4198_p1 = pmov %p4195_p3 }
  0x5f   : > { %3352 = vsyncadd (%p4197_p7), [#allocation9], 4294966944 }
  0x60   : > { %3354 = dma.done.wait (%p4198_p1), [#allocation12], 96   ;;  %p4199_p2 = pmov %p4198_p1 }
  0x61   : > { %v3603_v0 = vld [vmem:[#allocation2] sm:$0xff]  ;;  %v3605_v1 = vld [vmem:[#allocation2 + $0x8] sm:$0xff]  ;;  %v3610_v5 = vld [vmem:[#allocation2 + $0x18] sm:$0xff]  ;;  %v3392_v28 = vmov 768.0   ;;  %s3393_s30 = smov 64   ;;  %vm1831_vm7 = vcmask 523264  }
  0x62   : > { %3356 = vsyncadd (%p4199_p2), [#allocation12], 4294967200  ;;  %v406_v2 = vunpack.c.l.bf16 %v3603_v0  ;;  %v407_v3 = vunpack.c.h.bf16 %v3603_v0  ;;  %v408_v4 = vunpack.c.l.bf16 %v3605_v1  ;;  %v3612_v6 = vld [vmem:[#allocation2 + $0x20] sm:$0xff]  ;;  %v3614_v7 = vld [vmem:[#allocation2 + $0x10] sm:$0xff]  ;;  %v412_v8 = vunpack.c.l.bf16 %v3610_v5  ;;  %s2026_s17 = sshll.u32 %s4170_s6, 4  ;;  %s3394_s16 = smov [#allocation13]   ;;  %s2027_s17 = int_to_ptr.hbm [resolvable:$true] %s2026_s17 }
  0x63   : > { %v413_v9 = vunpack.c.h.bf16 %v3610_v5  ;;  %v409_v10 = vunpack.c.h.bf16 %v3605_v1  ;;  %v414_v12 = vunpack.c.l.bf16 %v3612_v6  ;;  %v410_v14 = vunpack.c.l.bf16 %v3614_v7  ;;  %v3632_v17 = vld [vmem:[#allocation2 + $0x28] sm:$0xff]  ;;  %v2291_v33 = vld [vmem:[%s3586_s1 + $0xa8] sm:$0xf]  ;;  %v2820_v34 = vld [vmem:[%s3586_s1 + $0xb0] sm:$0xf0]  ;;  %s2024_s8 = sshll.u32 %s3394_s16, 4  ;;  %s2025_s8 = int_to_ptr.vmem [resolvable:$true] %s2024_s8 }
  0x64   : > { %v420_v11 = vadd.f32 %v407_v3, %v406_v2  ;;  %v415_v16 = vunpack.c.h.bf16 %v3612_v6  ;;  %v411_v19 = vunpack.c.h.bf16 %v3614_v7  ;;  %v416_v22 = vunpack.c.l.bf16 %v3632_v17  ;;  %v2387_v35 = vld [vmem:[%s3586_s1 + $0x168] sm:$0xf]  ;;  %v2844_v38 = vld [vmem:[%s3586_s1 + $0x170] sm:$0xf0]  ;;  %v2279_v45 = vld [vmem:[%s3586_s1 + $0x90] sm:$0xf] }
  0x65   : > { %v427_v13 = vadd.f32 %v413_v9, %v412_v8  ;;  %v417_v25 = vunpack.c.h.bf16 %v3632_v17  ;;  %3067 = vrcp.f32 %v3392_v28  ;;  %v2292_v37 = vor.u32 %v2820_v34, %v2291_v33  ;;  %v2483_v39 = vld [vmem:[%s3586_s1 + $0x228] sm:$0xf]  ;;  %v2868_v40 = vld [vmem:[%s3586_s1 + $0x230] sm:$0xf0]  ;;  %v2817_v47 = vld [vmem:[%s3586_s1 + $0x98] sm:$0xf0] }
  0x66   : > { %v421_v15 = vadd.f32 %v420_v11, %v408_v4  ;;  %v2388_v41 = vor.u32 %v2844_v38, %v2387_v35  ;;  %v2484_v42 = vor.u32 %v2868_v40, %v2483_v39  ;;  %v2579_v43 = vld [vmem:[%s3586_s1 + $0x2e8] sm:$0xf]  ;;  %v2892_v44 = vld [vmem:[%s3586_s1 + $0x2f0] sm:$0xf0]  ;;  %v2375_v48 = vld [vmem:[%s3586_s1 + $0x150] sm:$0xf]  ;;  %v2280_v50 = vor.u32 %v2817_v47, %v2279_v45 }
  0x67   : > { %v428_v18 = vadd.f32 %v427_v13, %v414_v12  ;;  %1577 = vmatpush.bf16.msra.mxu0 %v2292_v37  ;;  %v2580_v46 = vor.u32 %v2892_v44, %v2579_v43  ;;  %v2841_v49 = vld [vmem:[%s3586_s1 + $0x158] sm:$0xf0]  ;;  %v2471_v52 = vld [vmem:[%s3586_s1 + $0x210] sm:$0xf]  ;;  %v2267_v58 = vld [vmem:[%s3586_s1 + $0x78] sm:$0xf] }
  0x68   : > { %v422_v20 = vadd.f32 %v421_v15, %v409_v10  ;;  %1591 = vmatpush.bf16.msra.mxu1 %v2388_v41  ;;  %1605 = vmatpush.bf16.msra.mxu2 %v2484_v42  ;;  %v2376_v51 = vor.u32 %v2841_v49, %v2375_v48  ;;  %v2865_v53 = vld [vmem:[%s3586_s1 + $0x218] sm:$0xf0]  ;;  %v2567_v54 = vld [vmem:[%s3586_s1 + $0x2d0] sm:$0xf]  ;;  %v2814_v59 = vld [vmem:[%s3586_s1 + $0x80] sm:$0xf0] }
  0x69   : > { %v429_v23 = vadd.f32 %v428_v18, %v415_v16  ;;  %1619 = vmatpush.bf16.msra.mxu3 %v2580_v46  ;;  %v2472_v56 = vor.u32 %v2865_v53, %v2471_v52  ;;  %v2889_v57 = vld [vmem:[%s3586_s1 + $0x2d8] sm:$0xf0]  ;;  %v2363_v61 = vld [vmem:[%s3586_s1 + $0x138] sm:$0xf]  ;;  %v2838_v62 = vld [vmem:[%s3586_s1 + $0x140] sm:$0xf0]  ;;  %v2268_v13 = vor.u32 %v2814_v59, %v2267_v58 }
  0x6a   : > { %v423_v21 = vadd.f32 %v422_v20, %v410_v14  ;;  %v2568_v60 = vor.u32 %v2889_v57, %v2567_v54  ;;  %v2459_v63 = vld [vmem:[%s3586_s1 + $0x1f8] sm:$0xf]  ;;  %v2862_v15 = vld [vmem:[%s3586_s1 + $0x200] sm:$0xf0]  ;;  %v2859_v35 = vld [vmem:[%s3586_s1 + $0x1e8] sm:$0xf0] }
  0x6b   : > { %v430_v26 = vadd.f32 %v429_v23, %v416_v22  ;;  %v3068_v29 = vpop.eup %3067  ;;  %1578 = vmatpush.bf16.msra.mxu0 %v2280_v50  ;;  %v2555_v18 = vld [vmem:[%s3586_s1 + $0x2b8] sm:$0xf]  ;;  %v2886_v20 = vld [vmem:[%s3586_s1 + $0x2c0] sm:$0xf0]  ;;  %v2364_v23 = vor.u32 %v2838_v62, %v2363_v61  ;;  %v2883_v37 = vld [vmem:[%s3586_s1 + $0x2a8] sm:$0xf0] }
  0x6c   : > { %v424_v24 = vadd.f32 %v423_v21, %v411_v19  ;;  %v435_v30 = vmul.f32 768.0, %v3068_v29  ;;  %vm439_vm0 = vweird.f32 %v3068_v29  ;;  %1592 = vmatpush.bf16.msra.mxu1 %v2376_v51  ;;  %1606 = vmatpush.bf16.msra.mxu2 %v2472_v56  ;;  %v2556_v28 = vor.u32 %v2886_v20, %v2555_v18  ;;  %v2243_v17 = vld [vmem:[%s3586_s1 + $0x48] sm:$0xf]  ;;  %v2832_v62 = vld [vmem:[%s3586_s1 + $0x110] sm:$0xf0]  ;;  %s3395_s19 = smov 384  }
  0x6d   : > { %v431_v27 = vadd.f32 %v430_v26, %v417_v25  ;;  %v2811_v26 = vld [vmem:[%s3586_s1 + $0x68] sm:$0xf0]  ;;  %1620 = vmatpush.bf16.msra.mxu3 %v2568_v60  ;;  %v2339_v60 = vld [vmem:[%s3586_s1 + $0x108] sm:$0xf]  ;;  %v2880_v20 = vld [vmem:[%s3586_s1 + $0x290] sm:$0xf0] }
  0x6e   : > { %425 = vadd.xlane.f32.xlu0 %v424_v24  ;;  %v436_v31 = vsub.f32 1.0, %v435_v30  ;;  %v2255_v24 = vld [vmem:[%s3586_s1 + $0x60] sm:$0xf]  ;;  %v2835_v30 = vld [vmem:[%s3586_s1 + $0x128] sm:$0xf0]  ;;  %vm1871_vm8 = vcmask 130048  }
  0x6f   : > { %1579 = vmatpush.bf16.msra.mxu0 %v2268_v13  ;;  %v2256_v38 = vor.u32 %v2811_v26, %v2255_v24  ;;  %v2340_v13 = vor.u32 %v2832_v62, %v2339_v60  ;;  %v2531_v18 = vld [vmem:[%s3586_s1 + $0x288] sm:$0xf]  ;;  %v2805_v24 = vld [vmem:[%s3586_s1 + $0x38] sm:$0xf0]  ;;  %v2327_v26 = vld [vmem:[%s3586_s1 + $0xf0] sm:$0xf] }
  0x70   : > { %v437_v32 = vmul.f32 %v3068_v29, %v436_v31  ;;  %v2447_v31 = vld [vmem:[%s3586_s1 + $0x1e0] sm:$0xf]  ;;  %1593 = vmatpush.bf16.msra.mxu1 %v2364_v23  ;;  %v2231_v23 = vld [vmem:[%s3586_s1 + $0x30] sm:$0xf]  ;;  %v2293_v62 = vld [vmem:[%s3586_s1 + $0xb4] sm:$0xf0] }
  0x71   : > { %1621 = vmatpush.bf16.msra.mxu3 %v2556_v28  ;;  %v2448_v40 = vor.u32 %v2859_v35, %v2447_v31  ;;  %v2829_v28 = vld [vmem:[%s3586_s1 + $0xf8] sm:$0xf0]  ;;  %s3396_s10 = smov 24   ;;  %p4200_p4 = scmp.eq.s32.totalorder %s3459_s28, 5 }
  0x72   : > { %v438_v36 = vadd.f32 %v3068_v29, %v437_v32  ;;  %v2328_v31 = vor.u32 %v2829_v28, %v2327_v26  ;;  %v2816_v26 = vld [vmem:[%s3586_s1 + $0x94] sm:$0xf]  ;;  %v2281_v28 = vld [vmem:[%s3586_s1 + $0x9c] sm:$0xf0]  ;;  %s2204_s24 = sshll.u32 %s3583_s14, 3  ;;  %s2793_s15 = sshll.u32 %s3459_s28, 2 }
  0x73   : > { %1580 = vmatpush.bf16.msra.mxu0 %v2256_v38  ;;  %s2039_s21 = scalar_lea.hbm %s4171_s7, %s2793_s15  ;;  %s396_s18 = scalar_lea.vmem [#allocation14], %s2204_s24 }
  0x74   : > { %v3667_v55 = vsel %vm439_vm0, %v3068_v29, %v438_v36  ;;  %v2351_v29 = vld [vmem:[%s3586_s1 + $0x120] sm:$0xf]  ;;  %s2040_s9 = sshll.u32 %s396_s18, 4  ;;  %s2042_s11 = sshll.u32 %s2039_s21, 4  ;;  %s2041_s9 = int_to_ptr.vmem [resolvable:$true] %s2040_s9  ;;  %s2043_s11 = int_to_ptr.hbm [resolvable:$true] %s2042_s11 }
  0x75   : > { %v2543_v36 = vld [vmem:[%s3586_s1 + $0x2a0] sm:$0xf]  ;;  %s3311_s3 = sshra.s32 %s2043_s11, 4  ;;  %s3312_s3 = int_to_ptr.hbm [resolvable:$true] %s3311_s3 }
  0x76   : > { %432 = vadd.xlane.f32.xlu0 %v431_v27  ;;  %v2460_v27 = vor.u32 %v2862_v15, %v2459_v63  ;;  %v2544_v41 = vor.u32 %v2883_v37, %v2543_v36  ;;  %v2435_v63 = vld [vmem:[%s3586_s1 + $0x1c8] sm:$0xf]  ;;  %v2519_v36 = vld [vmem:[%s3586_s1 + $0x270] sm:$0xf]  ;;  %v2877_v37 = vld [vmem:[%s3586_s1 + $0x278] sm:$0xf0]  ;;  %p3318_p13 = scmp.lt.s32.totalorder %s3312_s3, %s4171_s7 }
  0x77   : > { %v2520_v38 = vor.u32 %v2877_v37, %v2519_v36  ;;  %v2651_v36 = vld [vmem:[%s3586_s1 + $0x378] sm:$0xf]  ;;  %v2910_v37 = vld [vmem:[%s3586_s1 + $0x380] sm:$0xf0] }
  0x78   : > { %1607 = vmatpush.bf16.msra.mxu2 %v2460_v27  ;;  %1622 = vmatpush.bf16.msra.mxu3 %v2544_v41  ;;  %v2232_v27 = vor.u32 %v2805_v24, %v2231_v23  ;;  %v2826_v41 = vld [vmem:[%s3586_s1 + $0xe0] sm:$0xf0]  ;;  %v2759_v23 = vld [vmem:[%s3586_s1 + $0x450] sm:$0xf]  ;;  %v2937_v24 = vld [vmem:[%s3586_s1 + $0x458] sm:$0xf0] }
  0x7c   : > { %1608 = vmatpush.bf16.msra.mxu2 %v2448_v40 }
  0xe1   : > { %v426_v11 = vpop.xlane.xlu0 %425 }
  0xe2   : > { %v441_v21 = vmul.f32 %v3667_v55, %v426_v11  ;;  %v2856_v11 = vld [vmem:[%s3586_s1 + $0x1d0] sm:$0xf0] }
  0xe3   : > { %v2436_v15 = vor.u32 %v2856_v11, %v2435_v63  ;;  %v2843_v63 = vld [vmem:[%s3586_s1 + $0x16c] sm:$0xf] }
  0xe4   : > { %v3686_v32 = vsub.f32 %v406_v2, %v441_v21  ;;  %v3690_v33 = vsub.f32 %v407_v3, %v441_v21  ;;  %v3694_v34 = vsub.f32 %v408_v4, %v441_v21  ;;  %v3701_v39 = vsub.f32 %v409_v10, %v441_v21 }
  0xe5   : > { %v2352_v3 = vor.u32 %v2835_v30, %v2351_v29  ;;  %v3709_v4 = vsub.f32 %v410_v14, %v441_v21  ;;  %v3715_v43 = vsub.f32 %v411_v19, %v441_v21  ;;  %v2532_v21 = vor.u32 %v2880_v20, %v2531_v18  ;;  %1609 = vmatpush.bf16.msra.mxu2 %v2436_v15  ;;  %v2423_v29 = vld [vmem:[%s3586_s1 + $0x1b0] sm:$0xf]  ;;  %v2853_v30 = vld [vmem:[%s3586_s1 + $0x1b8] sm:$0xf0] }
  0xe6   : > { %v455_v2 = vmul.f32 %v3686_v32, %v3686_v32  ;;  %v456_v0 = vmul.f32 %v3690_v33, %v3690_v33  ;;  %v457_v1 = vmul.f32 %v3694_v34, %v3694_v34  ;;  %v458_v14 = vmul.f32 %v3701_v39, %v3701_v39  ;;  %v2663_v15 = vld [vmem:[%s3586_s1 + $0x390] sm:$0xf]  ;;  %v2913_v18 = vld [vmem:[%s3586_s1 + $0x398] sm:$0xf0] }
  0xe7   : > { %1594 = vmatpush.bf16.msra.mxu1 %v2352_v3  ;;  %v459_v46 = vmul.f32 %v3709_v4, %v3709_v4  ;;  %v460_v49 = vmul.f32 %v3715_v43, %v3715_v43  ;;  %1623 = vmatpush.bf16.msra.mxu3 %v2532_v21  ;;  %v2424_v35 = vor.u32 %v2853_v30, %v2423_v29  ;;  %v2315_v3 = vld [vmem:[%s3586_s1 + $0xd8] sm:$0xf]  ;;  %v2840_v29 = vld [vmem:[%s3586_s1 + $0x154] sm:$0xf]  ;;  %v2377_v30 = vld [vmem:[%s3586_s1 + $0x15c] sm:$0xf0] }
  0xe8   : > { %v467_v10 = vadd.f32 %v456_v0, %v455_v2  ;;  %v2219_v2 = vld [vmem:[%s3586_s1 + $0x18] sm:$0xf]  ;;  %v2802_v0 = vld [vmem:[%s3586_s1 + $0x20] sm:$0xf0]  ;;  %v2664_v21 = vor.u32 %v2913_v18, %v2663_v15  ;;  %v2711_v15 = vld [vmem:[%s3586_s1 + $0x3f0] sm:$0xf] }
  0xe9   : > { %v433_v42 = vpop.xlane.xlu0 %432  ;;  %1610 = vmatpush.bf16.msra.mxu2 %v2424_v35  ;;  %v2220_v40 = vor.u32 %v2802_v0, %v2219_v2  ;;  %v2380_v35 = vor.u32 %v2840_v29, %v2377_v30  ;;  %v2652_v2 = vor.u32 %v2910_v37, %v2651_v36  ;;  %v2934_v0 = vld [vmem:[%s3586_s1 + $0x440] sm:$0xf0]  ;;  %v2925_v18 = vld [vmem:[%s3586_s1 + $0x3f8] sm:$0xf0]  ;;  %v2329_v29 = vld [vmem:[%s3586_s1 + $0xfc] sm:$0xf0] }
  0xea   : > { %v442_v44 = vmul.f32 %v3667_v55, %v433_v42  ;;  %v468_v45 = vadd.f32 %v467_v10, %v457_v1  ;;  %v2411_v1 = vld [vmem:[%s3586_s1 + $0x198] sm:$0xf]  ;;  %v2850_v10 = vld [vmem:[%s3586_s1 + $0x1a0] sm:$0xf0]  ;;  %v2316_v42 = vor.u32 %v2826_v41, %v2315_v3  ;;  %v2813_v3 = vld [vmem:[%s3586_s1 + $0x7c] sm:$0xf] }
  0xeb   : > { %1595 = vmatpush.bf16.msra.mxu1 %v2340_v13  ;;  %1624 = vmatpush.bf16.msra.mxu3 %v2520_v38  ;;  %v2389_v13 = vld [vmem:[%s3586_s1 + $0x174] sm:$0xf0]  ;;  %v2922_v37 = vld [vmem:[%s3586_s1 + $0x3e0] sm:$0xf0] }
  0xec   : > { %v469_v47 = vadd.f32 %v468_v45, %v458_v14  ;;  %v3724_v48 = vsub.f32 %v412_v8, %v442_v44  ;;  %v3728_v7 = vsub.f32 %v413_v9, %v442_v44  ;;  %v3732_v19 = vsub.f32 %v414_v12, %v442_v44  ;;  %v2507_v14 = vld [vmem:[%s3586_s1 + $0x258] sm:$0xf]  ;;  %v2874_v45 = vld [vmem:[%s3586_s1 + $0x260] sm:$0xf0] }
  0xed   : > { %v3738_v51 = vsub.f32 %v415_v16, %v442_v44  ;;  %v3746_v12 = vsub.f32 %v416_v22, %v442_v44  ;;  %v3752_v16 = vsub.f32 %v417_v25, %v442_v44  ;;  %v2808_v25 = vld [vmem:[%s3586_s1 + $0x50] sm:$0xf0]  ;;  %v2412_v44 = vor.u32 %v2850_v10, %v2411_v1  ;;  %v2747_v38 = vld [vmem:[%s3586_s1 + $0x438] sm:$0xf]  ;;  %v2837_v10 = vld [vmem:[%s3586_s1 + $0x13c] sm:$0xf] }
  0xee   : > { %v470_v50 = vadd.f32 %v469_v47, %v459_v46  ;;  %v461_v8 = vmul.f32 %v3724_v48, %v3724_v48  ;;  %v462_v5 = vmul.f32 %v3728_v7, %v3728_v7  ;;  %v463_v52 = vmul.f32 %v3732_v19, %v3732_v19  ;;  %v2207_v47 = vld [vmem:[%s3586_s1] sm:$0xf]  ;;  %v2603_v30 = vld [vmem:[%s3586_s1 + $0x318] sm:$0xf] }
  0xef   : > { %v464_v53 = vmul.f32 %v3738_v51, %v3738_v51  ;;  %v465_v22 = vmul.f32 %v3746_v12, %v3746_v12  ;;  %v466_v57 = vmul.f32 %v3752_v16, %v3752_v16  ;;  %v2244_v61 = vor.u32 %v2808_v25, %v2243_v17  ;;  %1596 = vmatpush.bf16.msra.mxu1 %v2328_v31  ;;  %v2940_v17 = vld [vmem:[%s3586_s1 + $0x470] sm:$0xf0]  ;;  %v2699_v36 = vld [vmem:[%s3586_s1 + $0x3d8] sm:$0xf] }
  0xf0   : > { %v471_v9 = vadd.f32 %v470_v50, %v460_v49  ;;  %v474_v6 = vadd.f32 %v462_v5, %v461_v8  ;;  %v2508_v46 = vor.u32 %v2874_v45, %v2507_v14  ;;  %1611 = vmatpush.bf16.msra.mxu2 %v2412_v44  ;;  %v2799_v49 = vld [vmem:[%s3586_s1 + $0x8] sm:$0xf0]  ;;  %v2303_v50 = vld [vmem:[%s3586_s1 + $0xc0] sm:$0xf]  ;;  %v2392_v20 = vor.u32 %v2843_v63, %v2389_v13  ;;  %v2615_v63 = vld [vmem:[%s3586_s1 + $0x330] sm:$0xf] }
  0xf1   : > { %1581 = vmatpush.bf16.msra.mxu0 %v2244_v61  ;;  %v2208_v8 = vor.u32 %v2799_v49, %v2207_v47  ;;  %v2823_v5 = vld [vmem:[%s3586_s1 + $0xc8] sm:$0xf0]  ;;  %v2284_v31 = vor.u32 %v2816_v26, %v2281_v28  ;;  %v2748_v41 = vor.u32 %v2934_v0, %v2747_v38  ;;  %v2639_v14 = vld [vmem:[%s3586_s1 + $0x360] sm:$0xf]  ;;  %v2901_v13 = vld [vmem:[%s3586_s1 + $0x338] sm:$0xf0]  ;;  %v2712_v28 = vor.u32 %v2925_v18, %v2711_v15 }
  0xf2   : > { %472 = vadd.xlane.f32.xlu1 %v471_v9  ;;  %v475_v54 = vadd.f32 %v474_v6, %v463_v52  ;;  %1625 = vmatpush.bf16.msra.mxu3 %v2508_v46  ;;  %v2399_v9 = vld [vmem:[%s3586_s1 + $0x180] sm:$0xf]  ;;  %v2847_v52 = vld [vmem:[%s3586_s1 + $0x188] sm:$0xf0]  ;;  %v2304_v6 = vor.u32 %v2823_v5, %v2303_v50  ;;  %v2810_v50 = vld [vmem:[%s3586_s1 + $0x64] sm:$0xf] }
  0xf3   : > { %1597 = vmatpush.bf16.msra.mxu1 %v2316_v42  ;;  %v2819_v61 = vld [vmem:[%s3586_s1 + $0xac] sm:$0xf]  ;;  %v2365_v42 = vld [vmem:[%s3586_s1 + $0x144] sm:$0xf0]  ;;  %v2735_v46 = vld [vmem:[%s3586_s1 + $0x420] sm:$0xf] }
  0xf4   : > { %v476_v56 = vadd.f32 %v475_v54, %v464_v53  ;;  %v2400_v53 = vor.u32 %v2847_v52, %v2399_v9  ;;  %v2495_v54 = vld [vmem:[%s3586_s1 + $0x240] sm:$0xf]  ;;  %v2296_v11 = vor.u32 %v2819_v61, %v2293_v62  ;;  %v2368_v44 = vor.u32 %v2837_v10, %v2365_v42  ;;  %v2907_v45 = vld [vmem:[%s3586_s1 + $0x368] sm:$0xf0]  ;;  %v2834_v52 = vld [vmem:[%s3586_s1 + $0x124] sm:$0xf] }
  0xf5   : > { %1582 = vmatpush.bf16.msra.mxu0 %v2232_v27  ;;  %v2760_v27 = vor.u32 %v2937_v24, %v2759_v23  ;;  %v2640_v47 = vor.u32 %v2907_v45, %v2639_v14  ;;  %v2931_v49 = vld [vmem:[%s3586_s1 + $0x428] sm:$0xf0]  ;;  %v2341_v62 = vld [vmem:[%s3586_s1 + $0x114] sm:$0xf0]  ;;  %v2233_v23 = vld [vmem:[%s3586_s1 + $0x3c] sm:$0xf0]  ;;  %v2700_v10 = vor.u32 %v2922_v37, %v2699_v36 }
  0xf6   : > { %v477_v58 = vadd.f32 %v476_v56, %v465_v22  ;;  %v2871_v22 = vld [vmem:[%s3586_s1 + $0x248] sm:$0xf0]  ;;  %v2675_v56 = vld [vmem:[%s3586_s1 + $0x3a8] sm:$0xf]  ;;  %1612 = vmatpush.bf16.msra.mxu2 %v2400_v53  ;;  %v2736_v5 = vor.u32 %v2931_v49, %v2735_v46  ;;  %v2828_v24 = vld [vmem:[%s3586_s1 + $0xf4] sm:$0xf] }
  0xf7   : > { %1598 = vmatpush.bf16.msra.mxu1 %v2304_v6  ;;  %v2353_v6 = vld [vmem:[%s3586_s1 + $0x12c] sm:$0xf0]  ;;  %v2831_v61 = vld [vmem:[%s3586_s1 + $0x10c] sm:$0xf]  ;;  %v2801_v0 = vld [vmem:[%s3586_s1 + $0x1c] sm:$0xf] }
  0xf8   : > { %v478_v59 = vadd.f32 %v477_v58, %v466_v57  ;;  %v2496_v57 = vor.u32 %v2871_v22, %v2495_v54  ;;  %v2916_v58 = vld [vmem:[%s3586_s1 + $0x3b0] sm:$0xf0]  ;;  %v2356_v53 = vor.u32 %v2834_v52, %v2353_v6  ;;  %v2627_v54 = vld [vmem:[%s3586_s1 + $0x348] sm:$0xf]  ;;  %v2591_v42 = vld [vmem:[%s3586_s1 + $0x300] sm:$0xf] }
  0xf9   : > { %1583 = vmatpush.bf16.msra.mxu0 %v2220_v40  ;;  %v2676_v25 = vor.u32 %v2916_v58, %v2675_v56  ;;  %v2269_v40 = vld [vmem:[%s3586_s1 + $0x84] sm:$0xf0]  ;;  %v2904_v22 = vld [vmem:[%s3586_s1 + $0x350] sm:$0xf0]  ;;  %v2895_v14 = vld [vmem:[%s3586_s1 + $0x308] sm:$0xf0] }
  0xfa   : > { %479 = vadd.xlane.f32.xlu1 %v478_v59  ;;  %v2771_v59 = vld [vmem:[%s3586_s1 + $0x468] sm:$0xf]  ;;  %1626 = vmatpush.bf16.msra.mxu3 %v2496_v57  ;;  %v2272_v1 = vor.u32 %v2813_v3, %v2269_v40  ;;  %v2628_v57 = vor.u32 %v2904_v22, %v2627_v54  ;;  %v2928_v58 = vld [vmem:[%s3586_s1 + $0x410] sm:$0xf0]  ;;  %v2825_v40 = vld [vmem:[%s3586_s1 + $0xdc] sm:$0xf]  ;;  %v2592_v6 = vor.u32 %v2895_v14, %v2591_v42 }
  0xfb   : > { %v2772_v60 = vor.u32 %v2940_v17, %v2771_v59  ;;  %1661 = vmatpush.bf16.msrb.mxu2 %v2296_v11  ;;  %v2723_v56 = vld [vmem:[%s3586_s1 + $0x408] sm:$0xf]  ;;  %v2807_v59 = vld [vmem:[%s3586_s1 + $0x4c] sm:$0xf]  ;;  %v2245_v17 = vld [vmem:[%s3586_s1 + $0x54] sm:$0xf0]  ;;  %v2344_v11 = vor.u32 %v2831_v61, %v2341_v62 }
  0xfc   : > { %v2221_v3 = vld [vmem:[%s3586_s1 + $0x24] sm:$0xf0]  ;;  %v2687_v45 = vld [vmem:[%s3586_s1 + $0x3c0] sm:$0xf]  ;;  %v2919_v46 = vld [vmem:[%s3586_s1 + $0x3c8] sm:$0xf0] }
  0xfd   : > { %1584 = vmatpush.bf16.msra.mxu0 %v2208_v8  ;;  %1647 = vmatpush.bf16.msrb.mxu1 %v2772_v60  ;;  %v2257_v8 = vld [vmem:[%s3586_s1 + $0x6c] sm:$0xf0]  ;;  %v2248_v60 = vor.u32 %v2807_v59, %v2245_v17  ;;  %v2798_v49 = vld [vmem:[%s3586_s1 + $0x4] sm:$0xf] }
  0xfe   : > { %1675 = vmatpush.bf16.msrb.mxu3 %v2392_v20  ;;  %v2260_v9 = vor.u32 %v2810_v50, %v2257_v8  ;;  %v2209_v50 = vld [vmem:[%s3586_s1 + $0xc] sm:$0xf0] }
  0xff   : > { %1662 = vmatpush.bf16.msrb.mxu2 %v2284_v31  ;;  %v2212_v54 = vor.u32 %v2798_v49, %v2209_v50 }
 0x101   : > { %1633 = vmatpush.bf16.msrb.mxu0 %v2676_v25  ;;  %1648 = vmatpush.bf16.msrb.mxu1 %v2760_v27  ;;  %v2724_v25 = vor.u32 %v2928_v58, %v2723_v56  ;;  %v2616_v27 = vor.u32 %v2901_v13, %v2615_v63 }
 0x102   : > { %1676 = vmatpush.bf16.msrb.mxu3 %v2380_v35  ;;  %v2898_v35 = vld [vmem:[%s3586_s1 + $0x320] sm:$0xf0] }
 0x103   : > { %1663 = vmatpush.bf16.msrb.mxu2 %v2272_v1  ;;  %v2604_v1 = vor.u32 %v2898_v35, %v2603_v30 }
 0x105   : > { %1634 = vmatpush.bf16.msrb.mxu0 %v2664_v21  ;;  %1649 = vmatpush.bf16.msrb.mxu1 %v2748_v41  ;;  %v2804_v21 = vld [vmem:[%s3586_s1 + $0x34] sm:$0xf]  ;;  %v2317_v41 = vld [vmem:[%s3586_s1 + $0xe4] sm:$0xf0] }
 0x106   : > { %1677 = vmatpush.bf16.msrb.mxu3 %v2368_v44  ;;  %v2236_v31 = vor.u32 %v2804_v21, %v2233_v23  ;;  %v2224_v44 = vor.u32 %v2801_v0, %v2221_v3 }
 0x107   : > { %1664 = vmatpush.bf16.msrb.mxu2 %v2260_v9  ;;  %v2305_v9 = vld [vmem:[%s3586_s1 + $0xcc] sm:$0xf0] }
 0x109   : > { %1635 = vmatpush.bf16.msrb.mxu0 %v2652_v2  ;;  %1650 = vmatpush.bf16.msrb.mxu1 %v2736_v5  ;;  %v2332_v2 = vor.u32 %v2828_v24, %v2329_v29  ;;  %v2822_v5 = vld [vmem:[%s3586_s1 + $0xc4] sm:$0xf] }
 0x10a   : > { %1678 = vmatpush.bf16.msrb.mxu3 %v2356_v53  ;;  %v2688_v53 = vor.u32 %v2919_v46, %v2687_v45 }
 0x10b   : > { %1665 = vmatpush.bf16.msrb.mxu2 %v2248_v60 }
 0x10d   : > { %1636 = vmatpush.bf16.msrb.mxu0 %v2640_v47  ;;  %1651 = vmatpush.bf16.msrb.mxu1 %v2724_v25  ;;  %v2320_v47 = vor.u32 %v2825_v40, %v2317_v41  ;;  %v3858_v25 = vld [vmem:[#allocation10] sm:$0x3f] }
 0x10e   : > { %1679 = vmatpush.bf16.msrb.mxu3 %v2344_v11  ;;  %v518_v62 = vperm.slane %v3858_v25, 0  ;;  %v519_v63 = vperm.slane %v3858_v25, 1  ;;  %v521_v21 = vperm.slane %v3858_v25, 3 }
 0x10f   : > { %1666 = vmatpush.bf16.msrb.mxu2 %v2236_v31 }
 0x111   : > { %1637 = vmatpush.bf16.msrb.mxu0 %v2628_v57  ;;  %1652 = vmatpush.bf16.msrb.mxu1 %v2712_v28  ;;  %v2308_v57 = vor.u32 %v2822_v5, %v2305_v9  ;;  %v522_v28 = vperm.slane %v3858_v25, 4 }
 0x112   : > { %1680 = vmatpush.bf16.msrb.mxu3 %v2332_v2 }
 0x113   : > { %1667 = vmatpush.bf16.msrb.mxu2 %v2224_v44 }
 0x115   : > { %1638 = vmatpush.bf16.msrb.mxu0 %v2616_v27  ;;  %1653 = vmatpush.bf16.msrb.mxu1 %v2700_v10 }
 0x116   : > { %1681 = vmatpush.bf16.msrb.mxu3 %v2320_v47 }
 0x117   : > { %1668 = vmatpush.bf16.msrb.mxu2 %v2212_v54 }
 0x119   : > { %1639 = vmatpush.bf16.msrb.mxu0 %v2604_v1  ;;  %1654 = vmatpush.bf16.msrb.mxu1 %v2688_v53 }
 0x11a   : > { %1682 = vmatpush.bf16.msrb.mxu3 %v2308_v57 }
 0x11d   : > { %1640 = vmatpush.bf16.msrb.mxu0 %v2592_v6 }
 0x165   : > { %v473_v20 = vpop.xlane.xlu1 %472 }
 0x166   : > { %v481_v26 = vmul.f32 %v473_v20, %v3667_v55  ;;  %v520_v20 = vperm.slane %v3858_v25, 2 }
 0x168   : > { %v483_v38 = vadd.f32 1e-12, %v481_v26 }
 0x16a   : > { %3069 = vrsqrt.f32 %v483_v38  ;;  %vm491_vm2 = vweird.f32 %v483_v38 }
 0x16d   : > { %v480_v8 = vpop.xlane.xlu1 %479 }
 0x16e   : > { %v482_v52 = vmul.f32 %v480_v8, %v3667_v55  ;;  %v3860_v55 = vld [vmem:[#allocation11] sm:$0x3f] }
 0x16f   : > { %v543_v15 = vperm.slane %v3860_v55, 0  ;;  %v544_v18 = vperm.slane %v3860_v55, 1  ;;  %v545_v23 = vperm.slane %v3860_v55, 2  ;;  %v546_v27 = vperm.slane %v3860_v55, 3 }
 0x170   : > { %v3070_v22 = vpop.eup %3069  ;;  %v484_v56 = vadd.f32 1e-12, %v482_v52  ;;  %v547_v2 = vperm.slane %v3860_v55, 4 }
 0x171   : > { %v486_v58 = vmul.f32 %v3070_v22, %v483_v38  ;;  %vm492_vm1 = vweird.f32 %v3070_v22  ;;  %v523_v38 = vperm.slane %v3858_v25, 5  ;;  %v2891_v25 = vld [vmem:[%s3586_s1 + $0x2ec] sm:$0xf] }
 0x172   : > { %3071 = vrsqrt.f32 %v484_v56  ;;  %vm493_vm3 = vmor %vm491_vm2, %vm492_vm1  ;;  %vm501_vm5 = vweird.f32 %v484_v56 }
 0x173   : > { %v487_v59 = vmul.f32 %v3070_v22, %v486_v58 }
 0x175   : > { %v488_v17 = vmul.f32 0.5, %v487_v59 }
 0x177   : > { %v489_v60 = vsub.f32 1.5, %v488_v17 }
 0x178   : > { %v3072_v61 = vpop.eup %3071 }
 0x179   : > { %v490_v11 = vmul.f32 %v3070_v22, %v489_v60  ;;  %v496_v13 = vmul.f32 %v3072_v61, %v484_v56  ;;  %vm502_vm4 = vweird.f32 %v3072_v61 }
 0x17a   : > { %vm503_vm6 = vmor %vm501_vm5, %vm502_vm4 }
 0x17b   : > { %v494_v24 = vsel %vm493_vm3, %v3070_v22, %v490_v11  ;;  %v497_v26 = vmul.f32 %v3072_v61, %v496_v13  ;;  %v2915_v11 = vld [vmem:[%s3586_s1 + $0x3ac] sm:$0xf]  ;;  %v2677_v13 = vld [vmem:[%s3586_s1 + $0x3b4] sm:$0xf0] }
 0x17c   : > { %v505_v29 = vmul.f32 %v494_v24, %v3686_v32  ;;  %v506_v30 = vmul.f32 %v494_v24, %v3690_v33  ;;  %v507_v31 = vmul.f32 %v494_v24, %v3694_v34  ;;  %v508_v35 = vmul.f32 %v494_v24, %v3701_v39 }
 0x17d   : > { %v498_v36 = vmul.f32 0.5, %v497_v26  ;;  %v509_v37 = vmul.f32 %v494_v24, %v3709_v4  ;;  %v510_v32 = vmul.f32 %v494_v24, %v3715_v43  ;;  %v548_v33 = vperm.slane %v3860_v55, 5 }
 0x17e   : > { %v530_v0 = vmul.f32 %v518_v62, %v505_v29  ;;  %v531_v3 = vmul.f32 %v519_v63, %v506_v30  ;;  %v532_v40 = vmul.f32 %v520_v20, %v507_v31  ;;  %v533_v41 = vmul.f32 %v521_v21, %v508_v35 }
 0x17f   : > { %v499_v1 = vsub.f32 1.5, %v498_v36  ;;  %v534_v4 = vmul.f32 %v522_v28, %v509_v37  ;;  %v535_v14 = vmul.f32 %v523_v38, %v510_v32  ;;  %v2864_v37 = vld [vmem:[%s3586_s1 + $0x214] sm:$0xf] }
 0x180   : > { %v555_v34 = vadd.f32 %v543_v15, %v530_v0  ;;  %v556_v10 = vadd.f32 %v544_v18, %v531_v3  ;;  %v557_v39 = vadd.f32 %v545_v23, %v532_v40  ;;  %v558_v42 = vadd.f32 %v546_v27, %v533_v41  ;;  %v2888_v41 = vld [vmem:[%s3586_s1 + $0x2d4] sm:$0xf] }
 0x181   : > { %v500_v44 = vmul.f32 %v3072_v61, %v499_v1  ;;  %v559_v49 = vadd.f32 %v547_v2, %v534_v4  ;;  %v560_v50 = vadd.f32 %v548_v33, %v535_v14  ;;  %v2680_v3 = vor.u32 %v2915_v11, %v2677_v13  ;;  %v2569_v1 = vld [vmem:[%s3586_s1 + $0x2dc] sm:$0xf0]  ;;  %v2912_v32 = vld [vmem:[%s3586_s1 + $0x394] sm:$0xf]  ;;  %v2461_v4 = vld [vmem:[%s3586_s1 + $0x204] sm:$0xf0] }
 0x182   : > { %v567_v45 = vpack.c.bf16 %v556_v10, %v555_v34  ;;  %v568_v46 = vpack.c.bf16 %v558_v42, %v557_v39  ;;  %v2936_v34 = vld [vmem:[%s3586_s1 + $0x454] sm:$0xf]  ;;  %v2761_v10 = vld [vmem:[%s3586_s1 + $0x45c] sm:$0xf0]  ;;  %v2572_v42 = vor.u32 %v2888_v41, %v2569_v1 }
 0x183   : > { %v504_v47 = vsel %vm503_vm6, %v3072_v61, %v500_v44  ;;  %v2861_v44 = vld [vmem:[%s3586_s1 + $0x1fc] sm:$0xf] }
 0x184   : > { %v511_v8 = vmul.f32 %v504_v47, %v3724_v48  ;;  %v512_v43 = vmul.f32 %v504_v47, %v3728_v7  ;;  %573 = vst [vmem:[#allocation13] sm:$0xff] %v567_v45  ;;  %v513_v5 = vmul.f32 %v504_v47, %v3732_v19  ;;  %v514_v9 = vmul.f32 %v504_v47, %v3738_v51 }
 0x185   : > { %574 = vst [vmem:[#allocation13 + $0x8] sm:$0xff] %v568_v46  ;;  %v515_v53 = vmul.f32 %v504_v47, %v3746_v12  ;;  %v516_v54 = vmul.f32 %v504_v47, %v3752_v16  ;;  %v3886_v48 = vpack.c.bf16 %v560_v50, %v559_v49  ;;  %v2867_v12 = vld [vmem:[%s3586_s1 + $0x22c] sm:$0xf]  ;;  %v2485_v16 = vld [vmem:[%s3586_s1 + $0x234] sm:$0xf0]  ;;  %v785_v61 = vunpack.c.l.b16 %v567_v45 }
 0x186   : > { %v536_v52 = vmul.f32 %v518_v62, %v511_v8  ;;  %v537_v6 = vmul.f32 %v519_v63, %v512_v43  ;;  %v538_v22 = vmul.f32 %v520_v20, %v513_v5  ;;  %v539_v56 = vmul.f32 %v521_v21, %v514_v9  ;;  %v2581_v63 = vld [vmem:[%s3586_s1 + $0x2f4] sm:$0xf0]  ;;  %v2939_v21 = vld [vmem:[%s3586_s1 + $0x46c] sm:$0xf]  ;;  %v2557_v47 = vld [vmem:[%s3586_s1 + $0x2c4] sm:$0xf0] }
 0x187   : > { %v540_v51 = vmul.f32 %v522_v28, %v515_v53  ;;  %v541_v57 = vmul.f32 %v523_v38, %v516_v54  ;;  %575 = vst [vmem:[#allocation13 + $0x10] sm:$0xff] %v3886_v48  ;;  %v787_v26 = vunpack.c.l.b16 %v568_v46  ;;  %v788_v28 = vunpack.c.h.b16 %v568_v46  ;;  %v2473_v38 = vld [vmem:[%s3586_s1 + $0x21c] sm:$0xf0]  ;;  %v2885_v46 = vld [vmem:[%s3586_s1 + $0x2bc] sm:$0xf] }
 0x188   : > { %v561_v7 = vadd.f32 %v543_v15, %v536_v52  ;;  %v562_v19 = vadd.f32 %v544_v18, %v537_v6  ;;  %v563_v58 = vadd.f32 %v545_v23, %v538_v22  ;;  %v564_v59 = vadd.f32 %v546_v27, %v539_v56  ;;  %v2773_v23 = vld [vmem:[%s3586_s1 + $0x474] sm:$0xf0]  ;;  %v2909_v49 = vld [vmem:[%s3586_s1 + $0x37c] sm:$0xf]  ;;  %v2653_v50 = vld [vmem:[%s3586_s1 + $0x384] sm:$0xf0] }
 0x189   : > { %v565_v55 = vadd.f32 %v547_v2, %v540_v51  ;;  %v566_v60 = vadd.f32 %v548_v33, %v541_v57  ;;  %v786_v18 = vunpack.c.h.b16 %v567_v45  ;;  %v2488_v35 = vor.u32 %v2867_v12, %v2485_v16  ;;  %v2665_v33 = vld [vmem:[%s3586_s1 + $0x39c] sm:$0xf0]  ;;  %v2933_v8 = vld [vmem:[%s3586_s1 + $0x43c] sm:$0xf]  ;;  %v2749_v43 = vld [vmem:[%s3586_s1 + $0x444] sm:$0xf0] }
 0x18a   : > { %v570_v17 = vpack.c.bf16 %v562_v19, %v561_v7  ;;  %v571_v62 = vpack.c.bf16 %v564_v59, %v563_v58  ;;  %v2584_v36 = vor.u32 %v2891_v25, %v2581_v63  ;;  %v2776_v40 = vor.u32 %v2939_v21, %v2773_v23  ;;  %v2858_v52 = vld [vmem:[%s3586_s1 + $0x1e4] sm:$0xf]  ;;  %v2449_v6 = vld [vmem:[%s3586_s1 + $0x1ec] sm:$0xf0]  ;;  %v2855_v16 = vld [vmem:[%s3586_s1 + $0x1cc] sm:$0xf] }
 0x18b   : > { %v3897_v24 = vpack.c.bf16 %v566_v60, %v565_v55  ;;  %v2476_v39 = vor.u32 %v2864_v37, %v2473_v38  ;;  %v2668_v14 = vor.u32 %v2912_v32, %v2665_v33  ;;  %v2764_v45 = vor.u32 %v2936_v34, %v2761_v10  ;;  %v2882_v22 = vld [vmem:[%s3586_s1 + $0x2a4] sm:$0xf]  ;;  %v2545_v56 = vld [vmem:[%s3586_s1 + $0x2ac] sm:$0xf0]  ;;  %v2437_v25 = vld [vmem:[%s3586_s1 + $0x1d4] sm:$0xf0] }
 0x18c   : > { %576 = vst [vmem:[#allocation13 + $0x18] sm:$0xff] %v570_v17  ;;  %v791_v15 = vunpack.c.l.b16 %v570_v17  ;;  %v792_v20 = vunpack.c.h.b16 %v570_v17  ;;  %v793_v27 = vunpack.c.l.b16 %v571_v62  ;;  %v794_v29 = vunpack.c.h.b16 %v571_v62  ;;  %v2906_v7 = vld [vmem:[%s3586_s1 + $0x364] sm:$0xf]  ;;  %v2641_v19 = vld [vmem:[%s3586_s1 + $0x36c] sm:$0xf0] }
 0x18d   : > { %577 = vst [vmem:[#allocation13 + $0x20] sm:$0xff] %v571_v62  ;;  %v2464_v5 = vor.u32 %v2861_v44, %v2461_v4  ;;  %v2560_v9 = vor.u32 %v2885_v46, %v2557_v47  ;;  %v2656_v53 = vor.u32 %v2909_v49, %v2653_v50  ;;  %v2752_v54 = vor.u32 %v2933_v8, %v2749_v43  ;;  %v2930_v51 = vld [vmem:[%s3586_s1 + $0x424] sm:$0xf]  ;;  %v2737_v57 = vld [vmem:[%s3586_s1 + $0x42c] sm:$0xf0] }
 0x18e   : > { %v3899_v30 = vpack.c.b16 %v791_v15, %v785_v61  ;;  %v3901_v31 = vpack.c.b16 %v792_v20, %v786_v18  ;;  %578 = vst [vmem:[#allocation13 + $0x28] sm:$0xff] %v3897_v24  ;;  %v3906_v2 = vpack.c.b16 %v793_v27, %v787_v26  ;;  %v3908_v0 = vpack.c.b16 %v794_v29, %v788_v28  ;;  %v2879_v61 = vld [vmem:[%s3586_s1 + $0x28c] sm:$0xf]  ;;  %v2533_v62 = vld [vmem:[%s3586_s1 + $0x294] sm:$0xf0] }
 0x18f   : > { %v2452_v58 = vor.u32 %v2858_v52, %v2449_v6  ;;  %v2548_v59 = vor.u32 %v2882_v22, %v2545_v56  ;;  %v795_v17 = vunpack.c.l.b16 %v3897_v24  ;;  %v796_v12 = vunpack.c.h.b16 %v3897_v24  ;;  %v2903_v63 = vld [vmem:[%s3586_s1 + $0x34c] sm:$0xf]  ;;  %v2629_v15 = vld [vmem:[%s3586_s1 + $0x354] sm:$0xf0]  ;;  %v2852_v27 = vld [vmem:[%s3586_s1 + $0x1b4] sm:$0xf] }
 0x190   : > { %1585 = vmatmul.bf16.vlgmr.msra.gmra.mxu0 %v3899_v30  ;;  %1599 = vmatmul.bf16.vlgmr.msra.gmra.mxu1 %v3901_v31  ;;  %v2644_v55 = vor.u32 %v2906_v7, %v2641_v19  ;;  %v2740_v60 = vor.u32 %v2930_v51, %v2737_v57  ;;  %v789_v11 = vunpack.c.l.b16 %v3886_v48  ;;  %v790_v13 = vunpack.c.h.b16 %v3886_v48  ;;  %v2927_v18 = vld [vmem:[%s3586_s1 + $0x40c] sm:$0xf]  ;;  %v2725_v20 = vld [vmem:[%s3586_s1 + $0x414] sm:$0xf0]  ;;  %v2425_v28 = vld [vmem:[%s3586_s1 + $0x1bc] sm:$0xf0] }
 0x191   : > { %1613 = vmatmul.bf16.vlgmr.msra.gmra.mxu2 %v3906_v2  ;;  %1627 = vmatmul.bf16.vlgmr.msra.gmra.mxu3 %v3908_v0  ;;  %v2440_v21 = vor.u32 %v2855_v16, %v2437_v25  ;;  %v2536_v26 = vor.u32 %v2879_v61, %v2533_v62  ;;  %v2632_v48 = vor.u32 %v2903_v63, %v2629_v15  ;;  %v2900_v37 = vld [vmem:[%s3586_s1 + $0x334] sm:$0xf]  ;;  %v2617_v38 = vld [vmem:[%s3586_s1 + $0x33c] sm:$0xf0]  ;;  %v2849_v32 = vld [vmem:[%s3586_s1 + $0x19c] sm:$0xf] }
 0x192   : > { %1689 = vmatpush.bf16.msra.mxu0 %v2488_v35  ;;  %1703 = vmatpush.bf16.msra.mxu1 %v2584_v36  ;;  %v3948_v23 = vpack.c.b16 %v795_v17, %v789_v11  ;;  %v3950_v24 = vpack.c.b16 %v796_v12, %v790_v13  ;;  %v2728_v29 = vor.u32 %v2927_v18, %v2725_v20  ;;  %v2876_v35 = vld [vmem:[%s3586_s1 + $0x274] sm:$0xf]  ;;  %v2521_v36 = vld [vmem:[%s3586_s1 + $0x27c] sm:$0xf0]  ;;  %v2413_v33 = vld [vmem:[%s3586_s1 + $0x1a4] sm:$0xf0] }
 0x193   : > { %1717 = vmatpush.bf16.msra.mxu2 %v2680_v3  ;;  %1731 = vmatpush.bf16.msra.mxu3 %v2776_v40  ;;  %v2924_v3 = vld [vmem:[%s3586_s1 + $0x3f4] sm:$0xf]  ;;  %v2713_v40 = vld [vmem:[%s3586_s1 + $0x3fc] sm:$0xf0]  ;;  %v2428_v41 = vor.u32 %v2852_v27, %v2425_v28  ;;  %v2524_v1 = vor.u32 %v2876_v35, %v2521_v36  ;;  %v2620_v34 = vor.u32 %v2900_v37, %v2617_v38  ;;  %v2897_v44 = vld [vmem:[%s3586_s1 + $0x31c] sm:$0xf] }
 0x194   : > { %v2716_v10 = vor.u32 %v2924_v3, %v2713_v40  ;;  %v2605_v4 = vld [vmem:[%s3586_s1 + $0x324] sm:$0xf0]  ;;  %v2846_v46 = vld [vmem:[%s3586_s1 + $0x184] sm:$0xf]  ;;  %v2416_v47 = vor.u32 %v2849_v32, %v2413_v33  ;;  %v2401_v50 = vld [vmem:[%s3586_s1 + $0x18c] sm:$0xf0] }
 0x195   : > { %v2870_v8 = vld [vmem:[%s3586_s1 + $0x244] sm:$0xf]  ;;  %v2497_v43 = vld [vmem:[%s3586_s1 + $0x24c] sm:$0xf0]  ;;  %v2821_v56 = vld [vmem:[%s3586_s1 + $0xb8] sm:$0xf0]  ;;  %v2404_v57 = vor.u32 %v2846_v46, %v2401_v50 }
 0x196   : > { %1690 = vmatpush.bf16.msra.mxu0 %v2476_v39  ;;  %1704 = vmatpush.bf16.msra.mxu1 %v2572_v42  ;;  %v2873_v39 = vld [vmem:[%s3586_s1 + $0x25c] sm:$0xf]  ;;  %v2509_v42 = vld [vmem:[%s3586_s1 + $0x264] sm:$0xf0]  ;;  %v2894_v52 = vld [vmem:[%s3586_s1 + $0x304] sm:$0xf] }
 0x197   : > { %1718 = vmatpush.bf16.msra.mxu2 %v2668_v14  ;;  %1732 = vmatpush.bf16.msra.mxu3 %v2764_v45  ;;  %v2921_v14 = vld [vmem:[%s3586_s1 + $0x3dc] sm:$0xf]  ;;  %v2701_v45 = vld [vmem:[%s3586_s1 + $0x3e4] sm:$0xf0]  ;;  %v2512_v49 = vor.u32 %v2873_v39, %v2509_v42  ;;  %v2593_v6 = vld [vmem:[%s3586_s1 + $0x30c] sm:$0xf0] }
 0x198   : > { %v2299_v22 = vld [vmem:[%s3586_s1 + $0xb0] sm:$0xf]  ;;  %v2845_v19 = vld [vmem:[%s3586_s1 + $0x178] sm:$0xf0]  ;;  %v2596_v16 = vor.u32 %v2894_v52, %v2593_v6  ;;  %v2287_v61 = vld [vmem:[%s3586_s1 + $0x98] sm:$0xf] }
 0x199   : > { %v2395_v7 = vld [vmem:[%s3586_s1 + $0x170] sm:$0xf]  ;;  %v2893_v12 = vld [vmem:[%s3586_s1 + $0x2f8] sm:$0xf0]  ;;  %v2818_v62 = vld [vmem:[%s3586_s1 + $0xa0] sm:$0xf0] }
 0x19a   : > { %1691 = vmatpush.bf16.msra.mxu0 %v2464_v5  ;;  %1705 = vmatpush.bf16.msra.mxu1 %v2560_v9  ;;  %v2608_v5 = vor.u32 %v2897_v44, %v2605_v4  ;;  %v2704_v9 = vor.u32 %v2921_v14, %v2701_v45  ;;  %v2491_v51 = vld [vmem:[%s3586_s1 + $0x230] sm:$0xf]  ;;  %v2383_v13 = vld [vmem:[%s3586_s1 + $0x158] sm:$0xf]  ;;  %v2842_v15 = vld [vmem:[%s3586_s1 + $0x160] sm:$0xf0]  ;;  %v2288_v27 = vor.u32 %v2818_v62, %v2287_v61 }
 0x19b   : > { %1719 = vmatpush.bf16.msra.mxu2 %v2656_v53  ;;  %1733 = vmatpush.bf16.msra.mxu3 %v2752_v54  ;;  %v2918_v53 = vld [vmem:[%s3586_s1 + $0x3c4] sm:$0xf]  ;;  %v2689_v54 = vld [vmem:[%s3586_s1 + $0x3cc] sm:$0xf0]  ;;  %v2479_v18 = vld [vmem:[%s3586_s1 + $0x218] sm:$0xf]  ;;  %v2384_v28 = vor.u32 %v2842_v15, %v2383_v13 }
 0x19c   : > { %v2587_v17 = vld [vmem:[%s3586_s1 + $0x2f0] sm:$0xf]  ;;  %v2692_v25 = vor.u32 %v2918_v53, %v2689_v54  ;;  %v2866_v20 = vld [vmem:[%s3586_s1 + $0x220] sm:$0xf0]  ;;  %v2371_v37 = vld [vmem:[%s3586_s1 + $0x140] sm:$0xf] }
 0x19d   : > { %v2588_v11 = vor.u32 %v2893_v12, %v2587_v17  ;;  %v2480_v35 = vor.u32 %v2866_v20, %v2479_v18  ;;  %v2839_v38 = vld [vmem:[%s3586_s1 + $0x148] sm:$0xf0]  ;;  %v2467_v3 = vld [vmem:[%s3586_s1 + $0x200] sm:$0xf]  ;;  %v2359_v44 = vld [vmem:[%s3586_s1 + $0x128] sm:$0xf] }
 0x19e   : > { %1692 = vmatpush.bf16.msra.mxu0 %v2452_v58  ;;  %1706 = vmatpush.bf16.msra.mxu1 %v2548_v59  ;;  %v2500_v58 = vor.u32 %v2870_v8, %v2497_v43  ;;  %v2869_v59 = vld [vmem:[%s3586_s1 + $0x238] sm:$0xf0]  ;;  %v2863_v40 = vld [vmem:[%s3586_s1 + $0x208] sm:$0xf0]  ;;  %v2372_v33 = vor.u32 %v2839_v38, %v2371_v37  ;;  %v2836_v4 = vld [vmem:[%s3586_s1 + $0x130] sm:$0xf0] }
 0x19f   : > { %1720 = vmatpush.bf16.msra.mxu2 %v2644_v55  ;;  %1734 = vmatpush.bf16.msra.mxu3 %v2740_v60  ;;  %v2300_v55 = vor.u32 %v2821_v56, %v2299_v22  ;;  %v2396_v60 = vor.u32 %v2845_v19, %v2395_v7  ;;  %v2492_v63 = vor.u32 %v2869_v59, %v2491_v51  ;;  %v2455_v14 = vld [vmem:[%s3586_s1 + $0x1e8] sm:$0xf]  ;;  %v2860_v45 = vld [vmem:[%s3586_s1 + $0x1f0] sm:$0xf0]  ;;  %v2251_v8 = vld [vmem:[%s3586_s1 + $0x50] sm:$0xf] }
 0x1a0   : > { %1641 = vmatmul.bf16.vlgmr.msrb.gmra.mxu0 %v3948_v23  ;;  %1655 = vmatmul.bf16.vlgmr.msrb.gmra.mxu1 %v3950_v24  ;;  %v2468_v39 = vor.u32 %v2863_v40, %v2467_v3  ;;  %v2551_v46 = vld [vmem:[%s3586_s1 + $0x2a8] sm:$0xf]  ;;  %v2360_v50 = vor.u32 %v2836_v4, %v2359_v44  ;;  %v2809_v43 = vld [vmem:[%s3586_s1 + $0x58] sm:$0xf0]  ;;  %v2347_v52 = vld [vmem:[%s3586_s1 + $0x110] sm:$0xf] }
 0x1a1   : > { %1669 = vmatmul.bf16.vlgmr.msrb.gmra.mxu2 %v3899_v30  ;;  %1683 = vmatmul.bf16.vlgmr.msrb.gmra.mxu3 %v3901_v31  ;;  %v2833_v6 = vld [vmem:[%s3586_s1 + $0x118] sm:$0xf0]  ;;  %v2443_v53 = vld [vmem:[%s3586_s1 + $0x1d0] sm:$0xf]  ;;  %v2252_v7 = vor.u32 %v2809_v43, %v2251_v8  ;;  %v2239_v51 = vld [vmem:[%s3586_s1 + $0x38] sm:$0xf] }
 0x1a2   : > { %1693 = vmatpush.bf16.msra.mxu0 %v2440_v21  ;;  %1707 = vmatpush.bf16.msra.mxu1 %v2536_v26  ;;  %v2575_v21 = vld [vmem:[%s3586_s1 + $0x2d8] sm:$0xf]  ;;  %v2890_v26 = vld [vmem:[%s3586_s1 + $0x2e0] sm:$0xf0]  ;;  %v2857_v54 = vld [vmem:[%s3586_s1 + $0x1d8] sm:$0xf0]  ;;  %v2348_v19 = vor.u32 %v2833_v6, %v2347_v52 }
 0x1a3   : > { %1721 = vmatpush.bf16.msra.mxu2 %v2632_v48  ;;  %1735 = vmatpush.bf16.msra.mxu3 %v2728_v29  ;;  %v2275_v48 = vld [vmem:[%s3586_s1 + $0x80] sm:$0xf]  ;;  %v2815_v29 = vld [vmem:[%s3586_s1 + $0x88] sm:$0xf0]  ;;  %v2576_v36 = vor.u32 %v2890_v26, %v2575_v21  ;;  %v2539_v22 = vld [vmem:[%s3586_s1 + $0x290] sm:$0xf] }
 0x1a4   : > { %v2276_v32 = vor.u32 %v2815_v29, %v2275_v48  ;;  %v2881_v56 = vld [vmem:[%s3586_s1 + $0x298] sm:$0xf0]  ;;  %v2335_v17 = vld [vmem:[%s3586_s1 + $0xf8] sm:$0xf]  ;;  %v2830_v12 = vld [vmem:[%s3586_s1 + $0x100] sm:$0xf0] }
 0x1a5   : > { %v2540_v59 = vor.u32 %v2881_v56, %v2539_v22  ;;  %v2336_v62 = vor.u32 %v2830_v12, %v2335_v17  ;;  %v2323_v18 = vld [vmem:[%s3586_s1 + $0xe0] sm:$0xf]  ;;  %v2827_v20 = vld [vmem:[%s3586_s1 + $0xe8] sm:$0xf0]  ;;  %v2311_v37 = vld [vmem:[%s3586_s1 + $0xc8] sm:$0xf] }
 0x1a6   : > { %1694 = vmatpush.bf16.msra.mxu0 %v2428_v41  ;;  %1708 = vmatpush.bf16.msra.mxu1 %v2524_v1  ;;  %v2563_v41 = vld [vmem:[%s3586_s1 + $0x2c0] sm:$0xf]  ;;  %v2887_v1 = vld [vmem:[%s3586_s1 + $0x2c8] sm:$0xf0]  ;;  %v2324_v29 = vor.u32 %v2827_v20, %v2323_v18  ;;  %v2824_v40 = vld [vmem:[%s3586_s1 + $0xd0] sm:$0xf0] }
 0x1a7   : > { %1722 = vmatpush.bf16.msra.mxu2 %v2620_v34  ;;  %1736 = vmatpush.bf16.msra.mxu3 %v2716_v10  ;;  %v2263_v34 = vld [vmem:[%s3586_s1 + $0x68] sm:$0xf]  ;;  %v2812_v10 = vld [vmem:[%s3586_s1 + $0x70] sm:$0xf0]  ;;  %v2564_v42 = vor.u32 %v2887_v1, %v2563_v41  ;;  %v2419_v21 = vld [vmem:[%s3586_s1 + $0x1a0] sm:$0xf]  ;;  %v2312_v4 = vor.u32 %v2824_v40, %v2311_v37 }
 0x1a8   : > { %v2851_v26 = vld [vmem:[%s3586_s1 + $0x1a8] sm:$0xf0]  ;;  %v2407_v41 = vld [vmem:[%s3586_s1 + $0x188] sm:$0xf]  ;;  %v2848_v1 = vld [vmem:[%s3586_s1 + $0x190] sm:$0xf0] }
 0x1a9   : > { %v2420_v38 = vor.u32 %v2851_v26, %v2419_v21  ;;  %v2767_v8 = vld [vmem:[%s3586_s1 + $0x458] sm:$0xf]  ;;  %v2938_v43 = vld [vmem:[%s3586_s1 + $0x460] sm:$0xf0]  ;;  %v2659_v52 = vld [vmem:[%s3586_s1 + $0x380] sm:$0xf] }
 0x1aa   : > { %1695 = vmatpush.bf16.msra.mxu0 %v2416_v47  ;;  %1709 = vmatpush.bf16.msra.mxu1 %v2512_v49  ;;  %v2884_v47 = vld [vmem:[%s3586_s1 + $0x2b0] sm:$0xf0]  ;;  %v2264_v49 = vor.u32 %v2812_v10, %v2263_v34  ;;  %v2683_v34 = vld [vmem:[%s3586_s1 + $0x3b0] sm:$0xf]  ;;  %v2917_v10 = vld [vmem:[%s3586_s1 + $0x3b8] sm:$0xf0] }
 0x1ab   : > { %1723 = vmatpush.bf16.msra.mxu2 %v2608_v5  ;;  %1737 = vmatpush.bf16.msra.mxu3 %v2704_v9  ;;  %v2456_v5 = vor.u32 %v2860_v45, %v2455_v14  ;;  %v2552_v9 = vor.u32 %v2884_v47, %v2551_v46  ;;  %v2408_v14 = vor.u32 %v2848_v1, %v2407_v41  ;;  %v2911_v6 = vld [vmem:[%s3586_s1 + $0x388] sm:$0xf0]  ;;  %v2599_v21 = vld [vmem:[%s3586_s1 + $0x308] sm:$0xf]  ;;  %v2896_v26 = vld [vmem:[%s3586_s1 + $0x310] sm:$0xf0] }
 0x1ac   : > { %v2684_v46 = vor.u32 %v2917_v10, %v2683_v34  ;;  %v2660_v22 = vor.u32 %v2911_v6, %v2659_v52  ;;  %2972 = dma.vmem_to_hbm [thread:$0]  (%p4200_p4), %s2025_s8, 768, %s2027_s17, [#allocation4], %s3395_s19, %s3395_s19, %s3396_s10  }
 0x1ad   : > { %s3317_s17 = scalar_lea.hbm %s4171_s7, 48 }
 0x1ae   : > { %1696 = vmatpush.bf16.msra.mxu0 %v2404_v57  ;;  %1710 = vmatpush.bf16.msra.mxu1 %v2500_v58  ;;  %v2806_v57 = vld [vmem:[%s3586_s1 + $0x40] sm:$0xf0]  ;;  %v2444_v58 = vor.u32 %v2857_v54, %v2443_v53  ;;  %v2755_v53 = vld [vmem:[%s3586_s1 + $0x440] sm:$0xf]  ;;  %v2935_v54 = vld [vmem:[%s3586_s1 + $0x448] sm:$0xf0] }
 0x1af   : > { %1724 = vmatpush.bf16.msra.mxu2 %v2596_v16  ;;  %1738 = vmatpush.bf16.msra.mxu3 %v2692_v25  ;;  %v2431_v16 = vld [vmem:[%s3586_s1 + $0x1b8] sm:$0xf]  ;;  %v2854_v25 = vld [vmem:[%s3586_s1 + $0x1c0] sm:$0xf0]  ;;  %v2240_v61 = vor.u32 %v2806_v57, %v2239_v51  ;;  %v2756_v56 = vor.u32 %v2935_v54, %v2755_v53  ;;  %v2635_v57 = vld [vmem:[%s3586_s1 + $0x350] sm:$0xf] }
 0x1b0   : > { %v2432_v13 = vor.u32 %v2854_v25, %v2431_v16  ;;  %v2623_v16 = vld [vmem:[%s3586_s1 + $0x338] sm:$0xf]  ;;  %v2902_v25 = vld [vmem:[%s3586_s1 + $0x340] sm:$0xf0] }
 0x1b1   : > { %1697 = vmatmul.bf16.vlgmr.msra.gmra.mxu0 %v3906_v2  ;;  %1711 = vmatmul.bf16.vlgmr.msra.gmra.mxu1 %v3908_v0 }
 0x1b2   : > { %1745 = vmatpush.bf16.msrb.mxu0 %v2300_v55  ;;  %1759 = vmatpush.bf16.msrb.mxu1 %v2396_v60  ;;  %v2527_v55 = vld [vmem:[%s3586_s1 + $0x278] sm:$0xf]  ;;  %v2878_v60 = vld [vmem:[%s3586_s1 + $0x280] sm:$0xf0] }
 0x1b3   : > { %1773 = vmatpush.bf16.msrb.mxu2 %v2492_v63  ;;  %1787 = vmatpush.bf16.msrb.mxu3 %v2588_v11  ;;  %v2227_v63 = vld [vmem:[%s3586_s1 + $0x20] sm:$0xf]  ;;  %v2803_v11 = vld [vmem:[%s3586_s1 + $0x28] sm:$0xf0]  ;;  %v2528_v15 = vor.u32 %v2878_v60, %v2527_v55  ;;  %v2719_v55 = vld [vmem:[%s3586_s1 + $0x3f8] sm:$0xf] }
 0x1b4   : > { %1725 = vmatmul.bf16.vlgmr.msra.gmra.mxu2 %v3948_v23  ;;  %1739 = vmatmul.bf16.vlgmr.msra.gmra.mxu3 %v3950_v24  ;;  %v2228_v48 = vor.u32 %v2803_v11, %v2227_v63  ;;  %v2926_v60 = vld [vmem:[%s3586_s1 + $0x400] sm:$0xf0]  ;;  %v2611_v63 = vld [vmem:[%s3586_s1 + $0x320] sm:$0xf]  ;;  %v2899_v11 = vld [vmem:[%s3586_s1 + $0x328] sm:$0xf0] }
 0x1b5   : > { %v2612_v18 = vor.u32 %v2899_v11, %v2611_v63 }
 0x1b6   : > { %1746 = vmatpush.bf16.msrb.mxu0 %v2288_v27  ;;  %1760 = vmatpush.bf16.msrb.mxu1 %v2384_v28  ;;  %v2515_v27 = vld [vmem:[%s3586_s1 + $0x260] sm:$0xf]  ;;  %v2875_v28 = vld [vmem:[%s3586_s1 + $0x268] sm:$0xf0] }
 0x1b7   : > { %1774 = vmatpush.bf16.msrb.mxu2 %v2480_v35  ;;  %1788 = vmatpush.bf16.msrb.mxu3 %v2576_v36  ;;  %v2215_v35 = vld [vmem:[%s3586_s1 + $0x8] sm:$0xf]  ;;  %v2800_v36 = vld [vmem:[%s3586_s1 + $0x10] sm:$0xf0]  ;;  %v2516_v3 = vor.u32 %v2875_v28, %v2515_v27 }
 0x1b8   : > { %v2216_v44 = vor.u32 %v2800_v36, %v2215_v35  ;;  %v2695_v27 = vld [vmem:[%s3586_s1 + $0x3c8] sm:$0xf]  ;;  %v2920_v28 = vld [vmem:[%s3586_s1 + $0x3d0] sm:$0xf0]  ;;  %v4087_v35 = vld [vmem:[%s3593_s12] sm:$0x7] }
 0x1b9   : > { %v774_v54 = vperm.slane %v4087_v35, 1  ;;  %s3313_s12 = scalar_lea.hbm %s3312_s3, 8 }
 0x1ba   : > { %1747 = vmatpush.bf16.msrb.mxu0 %v2276_v32  ;;  %1761 = vmatpush.bf16.msrb.mxu1 %v2372_v33  ;;  %v2503_v32 = vld [vmem:[%s3586_s1 + $0x248] sm:$0xf]  ;;  %v2872_v33 = vld [vmem:[%s3586_s1 + $0x250] sm:$0xf0]  ;;  %p3314_p9 = scmp.ne.s32.totalorder %s3312_s3, %s3313_s12  ;;  %p3319_p0 = scmp.lt.s32.totalorder %s3317_s17, %s3313_s12 }
 0x1bb   : > { %1775 = vmatpush.bf16.msrb.mxu2 %v2468_v39  ;;  %1789 = vmatpush.bf16.msrb.mxu3 %v2564_v42  ;;  %v2779_v39 = vld [vmem:[%s3586_s1 + $0x470] sm:$0xf]  ;;  %v2941_v42 = vld [vmem:[%s3586_s1 + $0x478] sm:$0xf0]  ;;  %v2504_v45 = vor.u32 %v2872_v33, %v2503_v32 }
 0x1bc   : > { %v2780_v47 = vor.u32 %v2941_v42, %v2779_v39  ;;  %p3315_p10 = pnand %p3314_p9, %p3510_p5  ;;  %p3320_p11 = por %p3319_p0, %p3318_p13 }
 0x1be   : > { %1748 = vmatpush.bf16.msrb.mxu0 %v2264_v49  ;;  %1762 = vmatpush.bf16.msrb.mxu1 %v2360_v50  ;;  %v2671_v49 = vld [vmem:[%s3586_s1 + $0x398] sm:$0xf]  ;;  %v2914_v50 = vld [vmem:[%s3586_s1 + $0x3a0] sm:$0xf0]  ;;  %p3316_p12 = pneg %p3315_p10 }
 0x1bf   : > { %1776 = vmatpush.bf16.msrb.mxu2 %v2456_v5  ;;  %1790 = vmatpush.bf16.msrb.mxu3 %v2552_v9  ;;  %v2672_v5 = vor.u32 %v2914_v50, %v2671_v49  ;;  %v2768_v9 = vor.u32 %v2938_v43, %v2767_v8 }
 0x1c0   : > { %p3321_p3 = pnand %p3320_p11, %p3316_p12 }
 0x1c2   : > { %1749 = vmatpush.bf16.msrb.mxu0 %v2252_v7  ;;  %1763 = vmatpush.bf16.msrb.mxu1 %v2348_v19  ;;  %v2647_v7 = vld [vmem:[%s3586_s1 + $0x368] sm:$0xf]  ;;  %v2932_v19 = vld [vmem:[%s3586_s1 + $0x430] sm:$0xf0] }
 0x1c3   : > { %1777 = vmatpush.bf16.msrb.mxu2 %v2444_v58  ;;  %1791 = vmatpush.bf16.msrb.mxu3 %v2540_v59  ;;  %v2731_v58 = vld [vmem:[%s3586_s1 + $0x410] sm:$0xf]  ;;  %v2929_v59 = vld [vmem:[%s3586_s1 + $0x418] sm:$0xf0] }
 0x1c4   : > { %v2732_v12 = vor.u32 %v2929_v59, %v2731_v58 }
 0x1c6   : > { %1750 = vmatpush.bf16.msrb.mxu0 %v2240_v61  ;;  %1764 = vmatpush.bf16.msrb.mxu1 %v2336_v62  ;;  %v2624_v61 = vor.u32 %v2902_v25, %v2623_v16  ;;  %v2720_v62 = vor.u32 %v2926_v60, %v2719_v55 }
 0x1c7   : > { %1778 = vmatpush.bf16.msrb.mxu2 %v2432_v13  ;;  %1792 = vmatpush.bf16.msrb.mxu3 %v2528_v15  ;;  %v2707_v13 = vld [vmem:[%s3586_s1 + $0x3e0] sm:$0xf]  ;;  %v2923_v15 = vld [vmem:[%s3586_s1 + $0x3e8] sm:$0xf0] }
 0x1c8   : > { %v2708_v20 = vor.u32 %v2923_v15, %v2707_v13  ;;  %v775_v13 = vperm.slane %v4087_v35, 2 }
 0x1ca   : > { %1751 = vmatpush.bf16.msrb.mxu0 %v2228_v48  ;;  %1765 = vmatpush.bf16.msrb.mxu1 %v2324_v29  ;;  %v2600_v48 = vor.u32 %v2896_v26, %v2599_v21  ;;  %v2696_v29 = vor.u32 %v2920_v28, %v2695_v27 }
 0x1cb   : > { %1779 = vmatpush.bf16.msrb.mxu2 %v2420_v38  ;;  %1793 = vmatpush.bf16.msrb.mxu3 %v2516_v3  ;;  %v773_v38 = vperm.slane %v4087_v35, 0 }
 0x1ce   : > { %1752 = vmatpush.bf16.msrb.mxu0 %v2216_v44  ;;  %1766 = vmatpush.bf16.msrb.mxu1 %v2312_v4 }
 0x1cf   : > { %1780 = vmatpush.bf16.msrb.mxu2 %v2408_v14  ;;  %1794 = vmatpush.bf16.msrb.mxu3 %v2504_v45 }
 0x1d1   : > { %1753 = vmatmul.bf16.vlgmr.msrb.gmra.mxu0 %v3899_v30  ;;  %1767 = vmatmul.bf16.vlgmr.msrb.gmra.mxu1 %v3901_v31  ;;  %v2908_v30 = vld [vmem:[%s3586_s1 + $0x370] sm:$0xf0]  ;;  %v2743_v31 = vld [vmem:[%s3586_s1 + $0x428] sm:$0xf] }
 0x1d2   : > { %1801 = vmatpush.bf16.msra.mxu0 %v2684_v46  ;;  %1815 = vmatpush.bf16.msra.mxu1 %v2780_v47  ;;  %v2648_v51 = vor.u32 %v2908_v30, %v2647_v7 }
 0x1d3   : > { %1781 = vmatmul.bf16.vlgmr.msrb.gmra.mxu2 %v3906_v2  ;;  %1795 = vmatmul.bf16.vlgmr.msrb.gmra.mxu3 %v3908_v0  ;;  %v2744_v2 = vor.u32 %v2932_v19, %v2743_v31  ;;  %v2905_v0 = vld [vmem:[%s3586_s1 + $0x358] sm:$0xf0]  ;;  %s2015_s1 = scalar_lea.sflag [#allocation15], %s3583_s14 }
 0x1d4   : > { %v2636_v17 = vor.u32 %v2905_v0, %v2635_v57 }
 0x1d6   : > { %1802 = vmatpush.bf16.msra.mxu0 %v2672_v5  ;;  %1816 = vmatpush.bf16.msra.mxu1 %v2768_v9 }
 0x1da   : > { %1803 = vmatpush.bf16.msra.mxu0 %v2660_v22  ;;  %1817 = vmatpush.bf16.msra.mxu1 %v2756_v56 }
 0x1de   : > { %1804 = vmatpush.bf16.msra.mxu0 %v2648_v51  ;;  %1818 = vmatpush.bf16.msra.mxu1 %v2744_v2 }
 0x1e2   : > { %1805 = vmatpush.bf16.msra.mxu0 %v2636_v17  ;;  %1819 = vmatpush.bf16.msra.mxu1 %v2732_v12 }
 0x1e6   : > { %1806 = vmatpush.bf16.msra.mxu0 %v2624_v61  ;;  %1820 = vmatpush.bf16.msra.mxu1 %v2720_v62 }
 0x1ea   : > { %1807 = vmatpush.bf16.msra.mxu0 %v2612_v18  ;;  %1821 = vmatpush.bf16.msra.mxu1 %v2708_v20 }
 0x1ee   : > { %1808 = vmatpush.bf16.msra.mxu0 %v2600_v48  ;;  %1822 = vmatpush.bf16.msra.mxu1 %v2696_v29 }
 0x1f1   : > { %1809 = vmatmul.bf16.vlgmr.msra.gmra.mxu0 %v3948_v23  ;;  %1823 = vmatmul.bf16.vlgmr.msra.gmra.mxu1 %v3950_v24 }
 0x20d   : > { %v1586_v36 = vpop.f32.mrf.mxu0  ;;  %v1600_v37 = vpop.f32.mrf.mxu1 }
 0x20e   : > { %v1587_v3 = vadd.f32 %v1586_v36, %v773_v38 }
 0x210   : > { %v1601_v33 = vadd.f32 %v1600_v37, %v1587_v3 }
 0x214   : > { %v1614_v40 = vpop.f32.mrf.mxu2  ;;  %v1628_v41 = vpop.f32.mrf.mxu3 }
 0x215   : > { %v1588_v1 = vpop.f32.mrf.mxu0  ;;  %v1602_v32 = vpop.f32.mrf.mxu1  ;;  %v1615_v34 = vadd.f32 %v1614_v40, %v1601_v33 }
 0x216   : > { %v1589_v10 = vadd.f32 %v1588_v1, %v773_v38 }
 0x217   : > { %v1629_v39 = vadd.f32 %v1628_v41, %v1615_v34 }
 0x218   : > { %v1603_v24 = vadd.f32 %v1602_v32, %v1589_v10 }
 0x21c   : > { %v1616_v42 = vpop.f32.mrf.mxu2  ;;  %v1630_v44 = vpop.f32.mrf.mxu3 }
 0x21d   : > { %v1642_v23 = vpop.f32.mrf.mxu0  ;;  %v1656_v4 = vpop.f32.mrf.mxu1  ;;  %v1617_v45 = vadd.f32 %v1616_v42, %v1603_v24 }
 0x21e   : > { %v1643_v14 = vadd.f32 %v1642_v23, %v1629_v39 }
 0x21f   : > { %v1631_v47 = vadd.f32 %v1630_v44, %v1617_v45 }
 0x220   : > { %v1657_v46 = vadd.f32 %v1656_v4, %v1643_v14  ;;  %v1829_v14 = vld [vmem:[#allocation8] sm:$0xff] }
 0x222   : > { %1913 = vrot.lane.b32.xlu0 %v1657_v46, %s3393_s30 }
 0x224   : > { %v1670_v49 = vpop.f32.mrf.mxu2  ;;  %v1684_v50 = vpop.f32.mrf.mxu3 }
 0x225   : > { %v1644_v8 = vpop.f32.mrf.mxu0  ;;  %v1658_v5 = vpop.f32.mrf.mxu1  ;;  %v1671_v7 = vadd.f32 %v1670_v49, %v774_v54 }
 0x226   : > { %v1645_v43 = vadd.f32 %v1644_v8, %v1631_v47 }
 0x227   : > { %v1685_v2 = vadd.f32 %v1684_v50, %v1671_v7  ;;  %v1830_v50 = vld [vmem:[#allocation8 + $0x8] sm:$0xff] }
 0x228   : > { %v1659_v9 = vadd.f32 %v1658_v5, %v1645_v43 }
 0x22a   : > { %1915 = vrot.lane.b32.xlu1 %v1659_v9, %s3393_s30 }
 0x22c   : > { %v1672_v52 = vpop.f32.mrf.mxu2  ;;  %v1686_v6 = vpop.f32.mrf.mxu3 }
 0x22d   : > { %v1673_v56 = vadd.f32 %v1672_v52, %v774_v54 }
 0x22e   : > { %v1698_v53 = vpop.f32.mrf.mxu0  ;;  %v1712_v22 = vpop.f32.mrf.mxu1 }
 0x22f   : > { %v1687_v19 = vadd.f32 %v1686_v6, %v1673_v56  ;;  %v1699_v0 = vadd.f32 %v1698_v53, %v1685_v2 }
 0x231   : > { %v1713_v12 = vadd.f32 %v1712_v22, %v1699_v0 }
 0x236   : > { %v1700_v51 = vpop.f32.mrf.mxu0  ;;  %v1714_v58 = vpop.f32.mrf.mxu1 }
 0x237   : > { %v1726_v30 = vpop.f32.mrf.mxu2  ;;  %v1740_v31 = vpop.f32.mrf.mxu3  ;;  %v1701_v57 = vadd.f32 %v1700_v51, %v1687_v19 }
 0x238   : > { %v1727_v55 = vadd.f32 %v1726_v30, %v1713_v12 }
 0x239   : > { %v1715_v59 = vadd.f32 %v1714_v58, %v1701_v57 }
 0x23a   : > { %v1741_v61 = vadd.f32 %v1740_v31, %v1727_v55 }
 0x23f   : > { %v1728_v17 = vpop.f32.mrf.mxu2  ;;  %v1742_v25 = vpop.f32.mrf.mxu3 }
 0x240   : > { %v1729_v16 = vadd.f32 %v1728_v17, %v1715_v59 }
 0x242   : > { %v1743_v60 = vadd.f32 %v1742_v25, %v1729_v16 }
 0x244   : > { %1919 = vrot.lane.b32.xlu2 %v1743_v60, %s3393_s30  ;;  %2781 = vmatpush.xpose.msk.msra.mxu2 %vm1831_vm7, %v1743_v60 }
 0x248   : > { %2782 = vmatpush.xpose.msk.msra.mxu2 %vm1831_vm7, %v1741_v61 }
 0x24b   : > { %2783 = vmatmul.msk.f32.vlgmr.msra.gmra.mxu2 %vm1831_vm7, %v1657_v46 }
 0x24c   : > { %1917 = vrot.lane.b32.xlu2 %v1741_v61, %s3393_s30 }
 0x24e   : > { %v1754_v62 = vpop.f32.mrf.mxu0  ;;  %v1768_v63 = vpop.f32.mrf.mxu1 }
 0x24f   : > { %v1755_v20 = vadd.f32 %v1754_v62, %v775_v13 }
 0x251   : > { %v1769_v27 = vadd.f32 %v1768_v63, %v1755_v20 }
 0x253   : > { %2784 = vmatmul.msk.f32.gmra.mxu2 %vm1831_vm7, %v1659_v9 }
 0x256   : > { %v1782_v11 = vpop.f32.mrf.mxu2  ;;  %v1756_v15 = vpop.f32.mrf.mxu0 }
 0x257   : > { %v1770_v18 = vpop.f32.mrf.mxu1  ;;  %v1796_v21 = vpop.f32.mrf.mxu3  ;;  %v1757_v26 = vadd.f32 %v1756_v15, %v775_v13  ;;  %v1783_v36 = vadd.f32 %v1782_v11, %v1769_v27 }
 0x259   : > { %v1771_v37 = vadd.f32 %v1770_v18, %v1757_v26  ;;  %v1797_v3 = vadd.f32 %v1796_v21, %v1783_v36 }
 0x25e   : > { %v1784_v28 = vpop.f32.mrf.mxu2 }
 0x25f   : > { %v1785_v38 = vadd.f32 %v1784_v28, %v1771_v37  ;;  %v1798_v40 = vpop.f32.mrf.mxu3 }
 0x261   : > { %v1799_v41 = vadd.f32 %v1798_v40, %v1785_v38 }
 0x26e   : > { %v1810_v48 = vpop.f32.mrf.mxu0  ;;  %v1824_v29 = vpop.f32.mrf.mxu1 }
 0x26f   : > { %v1811_v1 = vadd.f32 %v1810_v48, %v1797_v3 }
 0x271   : > { %v1825_v35 = vadd.f32 %v1824_v29, %v1811_v1 }
 0x276   : > { %v1812_v32 = vpop.f32.mrf.mxu0  ;;  %v1826_v34 = vpop.f32.mrf.mxu1 }
 0x277   : > { %v1813_v33 = vadd.f32 %v1812_v32, %v1799_v41 }
 0x279   : > { %v1827_v10 = vadd.f32 %v1826_v34, %v1813_v33 }
 0x27b   : > { %v1895_v39 = vpack.c.bf16 %v1827_v10, %v1825_v35 }
 0x27d   : > { %1906 = vmatpush.bf16.msra.mxu3 %v1895_v39 }
 0x294   : > { %v1914_v23 = vpop.permute.xlu0 %1913 }
 0x29c   : > { %v1916_v4 = vpop.permute.xlu1 %1915 }
 0x29e   : > { %v1920_v42 = vpop.permute.xlu2 %1919 }
 0x29f   : > { %2786 = vmatpush.xpose.msk.msrb.mxu2 %vm1831_vm7, %v1920_v42 }
 0x2a6   : > { %v1918_v44 = vpop.permute.xlu2 %1917 }
 0x2a7   : > { %2787 = vmatpush.xpose.msk.msrb.mxu2 %vm1831_vm7, %v1918_v44 }
 0x2aa   : > { %2788 = vmatmul.msk.f32.vlgmr.msrb.gmra.mxu2 %vm1831_vm7, %v1914_v23 }
 0x2b2   : > { %2789 = vmatmul.msk.f32.gmra.mxu2 %vm1831_vm7, %v1916_v4 }
 0x2ce   : > { %v1861_v24 = vpop.f32.mrf.mxu2 }
 0x2cf   : > { %v1867_v45 = vmul.f32 0.125, %v1861_v24 }
 0x2d1   : > { %v1869_v46 = vadd.f32 %v1867_v45, %v1829_v14 }
 0x2d3   : > { %v1872_v47 = vsel %vm1871_vm8, %v1869_v46, -inf }
 0x2d4   : > { %1873 = vmax.xlane.f32.xlu2 %v1872_v47 }
 0x2d6   : > { %v1864_v49 = vpop.f32.mrf.mxu2 }
 0x2d7   : > { %v1868_v8 = vmul.f32 0.125, %v1864_v49 }
 0x2d9   : > { %v1870_v43 = vadd.f32 %v1868_v8, %v1830_v50 }
 0x2db   : > { %v1875_v5 = vsel %vm1871_vm8, %v1870_v43, -inf }
 0x2dc   : > { %1876 = vmax.xlane.f32.xlu0 %v1875_v5 }
 0x32d   : > { %v1946_v9 = vpop.f32.mrf.mxu2 }
 0x32e   : > { %v1952_v52 = vmul.f32 0.125, %v1946_v9 }
 0x330   : > { %v1954_v6 = vadd.f32 %v1952_v52, %v1829_v14 }
 0x332   : > { %v1956_v53 = vsel %vm1871_vm8, %v1954_v6, -inf }
 0x333   : > { %1957 = vmax.xlane.f32.xlu1 %v1956_v53 }
 0x335   : > { %v1949_v54 = vpop.f32.mrf.mxu2 }
 0x336   : > { %v1953_v22 = vmul.f32 0.125, %v1949_v54 }
 0x338   : > { %v1955_v56 = vadd.f32 %v1953_v22, %v1830_v50 }
 0x33a   : > { %v1959_v7 = vsel %vm1871_vm8, %v1955_v56, -inf }
 0x33b   : > { %1960 = vmax.xlane.f32.xlu2 %v1959_v7 }
 0x347   : > { %v1874_v30 = vpop.xlane.xlu2 %1873 }
 0x348   : > { %v1878_v31 = vsub.f32 %v1869_v46, %v1874_v30 }
 0x34a   : > { %v1880_v19 = vmul.f32 1.442695, %v1878_v31 }
 0x34c   : > { %3073 = vpow2.f32 %v1880_v19  ;;  %1980 = vrot.lane.b32.xlu1 %v1895_v39, %s3393_s30 }
 0x34f   : > { %v1877_v51 = vpop.xlane.xlu0 %1876 }
 0x350   : > { %v1879_v2 = vsub.f32 %v1870_v43, %v1877_v51 }
 0x352   : > { %v3074_v57 = vpop.eup %3073  ;;  %v1882_v0 = vmul.f32 1.442695, %v1879_v2 }
 0x353   : > { %v1884_v58 = vsel %vm1871_vm8, %v3074_v57, 0.0 }
 0x354   : > { %3075 = vpow2.f32 %v1882_v0  ;;  %1885 = vadd.xlane.f32.xlu2 %v1884_v58 }
 0x35a   : > { %v3076_v59 = vpop.eup %3075 }
 0x35b   : > { %v1887_v17 = vsel %vm1871_vm8, %v3076_v59, 0.0 }
 0x35c   : > { %1888 = vadd.xlane.f32.xlu2 %v1887_v17 }
 0x3a6   : > { %v1958_v12 = vpop.xlane.xlu1 %1957 }
 0x3a7   : > { %v1962_v16 = vsub.f32 %v1954_v6, %v1958_v12 }
 0x3a9   : > { %v1964_v25 = vmul.f32 1.442695, %v1962_v16 }
 0x3ab   : > { %3077 = vpow2.f32 %v1964_v25 }
 0x3ae   : > { %v1961_v55 = vpop.xlane.xlu2 %1960 }
 0x3af   : > { %v1963_v60 = vsub.f32 %v1955_v56, %v1961_v55 }
 0x3b1   : > { %v3078_v61 = vpop.eup %3077  ;;  %v1966_v62 = vmul.f32 1.442695, %v1963_v60 }
 0x3b2   : > { %v1968_v63 = vsel %vm1871_vm8, %v3078_v61, 0.0 }
 0x3b3   : > { %3079 = vpow2.f32 %v1966_v62  ;;  %1969 = vadd.xlane.f32.xlu0 %v1968_v63 }
 0x3b9   : > { %v3080_v11 = vpop.eup %3079 }
 0x3ba   : > { %v1971_v13 = vsel %vm1871_vm8, %v3080_v11, 0.0 }
 0x3bb   : > { %1972 = vadd.xlane.f32.xlu2 %v1971_v13 }
 0x3be   : > { %v1981_v15 = vpop.permute.xlu1 %1980 }
 0x3bf   : > { %1993 = vmatpush.bf16.msrb.mxu3 %v1981_v15 }
 0x3c7   : > { %v1886_v18 = vpop.xlane.xlu2 %1885 }
 0x3c8   : > { %3081 = vrcp.f32 %v1886_v18 }
 0x3ce   : > { %v3082_v21 = vpop.eup %3081 }
 0x3cf   : > { %v1889_v20 = vpop.xlane.xlu2 %1888  ;;  %v1892_v27 = vmul.f32 %v3082_v21, %v3074_v57 }
 0x3d0   : > { %3083 = vrcp.f32 %v1889_v20 }
 0x3d6   : > { %v3084_v26 = vpop.eup %3083 }
 0x3d7   : > { %v1893_v28 = vmul.f32 %v3084_v26, %v3076_v59 }
 0x3d9   : > { %v1894_v48 = vpack.c.bf16 %v1893_v28, %v1892_v27 }
 0x3db   : > { %2785 = vmatmul.msk.bf16.vlgmr.msra.gmra.mxu3 %vm1871_vm8, %v1894_v48 }
 0x426   : > { %v1970_v29 = vpop.xlane.xlu0 %1969 }
 0x427   : > { %3085 = vrcp.f32 %v1970_v29 }
 0x42d   : > { %v3086_v37 = vpop.eup %3085 }
 0x42e   : > { %v1973_v36 = vpop.xlane.xlu2 %1972  ;;  %v1976_v3 = vmul.f32 %v3086_v37, %v3078_v61 }
 0x42f   : > { %3087 = vrcp.f32 %v1973_v36 }
 0x435   : > { %v3088_v38 = vpop.eup %3087 }
 0x436   : > { %v1977_v40 = vmul.f32 %v3088_v38, %v3080_v11 }
 0x438   : > { %v1978_v41 = vpack.c.bf16 %v1977_v40, %v1976_v3 }
 0x43a   : > { %2790 = vmatmul.msk.bf16.vlgmr.msrb.gmra.mxu3 %vm1871_vm8, %v1978_v41 }
 0x45e   : > { %v1908_v1 = vpop.f32.mrf.mxu3 }
 0x466   : > { %v1910_v32 = vpop.f32.mrf.mxu3 }
 0x4bd   : > { %v1995_v33 = vpop.f32.mrf.mxu3 }
 0x4c5   : > { %v1997_v34 = vpop.f32.mrf.mxu3 }
 0x4c6   : > { %v3062_v35 = vpack.i.bf16 %v1997_v34, %v1995_v33 }
 0x4c8   : > { %3063 = vrot.lane.b32.xlu0 %v3062_v35, %s3393_s30 }
 0x53a   : > { %v3064_v10 = vpop.permute.xlu0 %3063 }
 0x53b   : > { %v3066_v39 = vunpack.i.h.bf16 %v3064_v10  ;;  %v3065_v42 = vunpack.i.l.bf16 %v3064_v10 }
 0x53d   : > { %v2009_v44 = vsel %vm1831_vm7, %v1910_v32, %v3066_v39  ;;  %v2008_v23 = vsel %vm1831_vm7, %v1908_v1, %v3065_v42 }
 0x53e   : > { %v2945_v4 = vpack.c.bf16 %v2009_v44, %v2008_v23 }
 0x540   : > { %2946 = vst [vmem:[%s396_s18] sm:$0xff] %v2945_v4  }
 0x541   : > { %3324 = shalt.err (!%p3321_p3)
}
 0x542   : > { %s3397_s14 = smov 4   ;;  %p4201_p8 = pmov %p4200_p4 }
 0x543   : > { %2973 = dma.vmem_to_hbm [thread:$0]  (%p3510_p5), %s2041_s9, 128, %s2043_s11, %s2015_s1, %s3393_s30, %s3395_s19, %s3397_s14  }
 0x544   : > { %3358 = dma.done.wait (%p4201_p8), [#allocation4], 768   ;;  %p4202_p7 = pmov %p4200_p4 }
 0x546   : > { %3360 = vsyncadd (%p4202_p7), [#allocation4], 4294966528 }
 0x547 PF: > { %s4203_s10 = sld [smem:[#allocation22_spill]]  ;;  %p3012_p1 = scmp.ge.s32.totalorder %s3379_s27, 2 }
 0x549   : > { %p2998_p2 = pnand %p3012_p1, %p3473_p6 }
 0x54b   : > { %p2999_p4 = pneg %p2998_p2 }
 0x54d   : > { %s2062_s15 = sand.u32 1, %s4203_s10  }
 0x54e   : > { %s2063_s20 = scalar_lea.sflag [#allocation15], %s2062_s15 }
 0x54f   : > { %3362 = dma.done.wait (%p2999_p4), %s2063_s20, 128  }
 0x550   : > { %3364 = vsyncadd (%p2999_p4), %s2063_s20, 4294967168  ;;  %s4205_s27 = sld [smem:[#allocation24_spill]]  ;;  %s4207_s24 = smov %s3371_s25 }
 0x551   : > { %s4206_s22 = sld [smem:[#allocation25_spill]]  ;;  %s4208_s25 = smov %s3375_s26 }
 0x556   : > { %p25_p5 = scmp.ge.s32.totalorder %s4205_s27, 8  }
 0x557   : > { %s4209_s26 = smov %s4206_s22 }
 0x558   :  { %27 = sbr.rel (!%p25_p5) target bundleno = 12 (0xc), region = 126 }
 0x55d   :  { %2069 = vsyncpa [#allocation3], 1 }
 0x55e   :  { %2071 = vsyncpa [#allocation3 + $0x1], 1 }
 0x55f   :  { %2072 = vsyncpa [#allocation6], 1 }
 0x560   :  { %2074 = vsyncpa [#allocation6 + $0x1], 1 }
 0x561   :  { %2075 = vsyncpa [#allocation9], 1 }
 0x562   :  { %2076 = vsyncpa [#allocation12], 1 }
 0x563   :  { %2077 = vsyncpa [#allocation4], 1 }
 0x564   :  { %2079 = vsyncpa [#allocation4 + $0x1], 1 }
 0x565   :  { %2080 = vsyncpa [#allocation15], 1 }
 0x566   :  { %2082 = vsyncpa [#allocation15 + $0x1], 1 }

</bundles_post_ra>
